<compile_context>
chip_gen: v6e
topology: v6e:2x2x1
jax: 0.10.0
libtpu: 0.0.40
codegen_flags: <defaults>
</compile_context>

<pallas_src>
import functools

import jax
import jax.numpy as jnp
from jax.experimental import pallas as pl
from jax.experimental.pallas import tpu as pltpu

_LN_EPS = 1e-5  # torch.nn.LayerNorm default eps


def _ln_elu(x, gamma, beta):
    """LayerNorm (biased var, eps=1e-5) followed by ELU(alpha=1)."""
    mu = jnp.mean(x, axis=-1, keepdims=True)
    var = jnp.mean(jnp.square(x - mu), axis=-1, keepdims=True)
    y = (x - mu) * jax.lax.rsqrt(var + _LN_EPS) * gamma + beta
    # NOTE: expm1(min(y,0)) would match torch.nn.ELU slightly better near 0,
    # but exp(.)-1 is kept for guaranteed Mosaic lowering (matches reference).
    return jnp.where(y > 0.0, y, jnp.exp(jnp.minimum(y, 0.0)) - 1.0)


def _seg_ln_elu(x, gamma, beta, seg0, inv_width):
    """LayerNorm+ELU applied independently to two equal lane segments of x.

    seg0: (1, N) bool mask, True on the first segment. Both segments have
    width 1/inv_width. Used for the fused [value_h | risk_h] activation.
    """
    s0 = jnp.sum(jnp.where(seg0, x, 0.0), axis=-1, keepdims=True)
    s1 = jnp.sum(jnp.where(seg0, 0.0, x), axis=-1, keepdims=True)
    mu = jnp.where(seg0, s0, s1) * inv_width
    d = x - mu
    d2 = d * d
    v0 = jnp.sum(jnp.where(seg0, d2, 0.0), axis=-1, keepdims=True)
    v1 = jnp.sum(jnp.where(seg0, 0.0, d2), axis=-1, keepdims=True)
    var = jnp.where(seg0, v0, v1) * inv_width
    y = d * jax.lax.rsqrt(var + _LN_EPS) * gamma + beta
    return jnp.where(y > 0.0, y, jnp.exp(jnp.minimum(y, 0.0)) - 1.0)


def _critic_kernel(obs_ref, act_ref,
                   w_f1_ref, w_f2_ref, w_a1_ref,
                   w_c1f_ref, w_c1a_ref, w_c2_ref,
                   w_vr1_ref, w_head_ref,
                   bias4_ref, gamma4_ref, beta4_ref,
                   a_par_ref, vr_par_ref, buckets_ref,
                   out_ref, *, num_buckets):
    f32 = jnp.float32
    h = w_f1_ref.shape[1]

    def mm(x, w_ref):
        w = w_ref[...]
        # Operands go to the MXU in the weights' dtype (f32 or bf16);
        # accumulation is always f32.
        return jnp.dot(x.astype(w.dtype), w, preferred_element_type=f32)

    # Stacked per-block params: rows 0..3 = [f1, f2, c1, c2]
    def b(i):  return bias4_ref[i:i + 1, :]
    def g(i):  return gamma4_ref[i:i + 1, :]
    def bt(i): return beta4_ref[i:i + 1, :]

    obs = obs_ref[...]
    act = act_ref[...]

    # feature_net: Linear -> LN -> ELU, twice
    f = _ln_elu(mm(obs, w_f1_ref) + b(0), g(0), bt(0))
    f = _ln_elu(mm(f, w_f2_ref) + b(1), g(1), bt(1))

    # action_net: Linear -> LN -> ELU  (a_par rows: [bias, gamma, beta])
    a = _ln_elu(mm(act, w_a1_ref) + a_par_ref[0:1, :],
                a_par_ref[1:2, :], a_par_ref[2:3, :])

    # combined_net: concat([f, a]) @ W_c1 as a split matmul, single accumulation
    # expression (no concat; MRB in-place accumulate on v7x).
    c = _ln_elu(mm(f, w_c1f_ref) + mm(a, w_c1a_ref) + b(2), g(2), bt(2))
    c = _ln_elu(mm(c, w_c2_ref) + b(3), g(3), bt(3))

    # Fused value/risk hidden layer: one (h, 2h) matmul, per-segment LayerNorm.
    vr_pre = mm(c, w_vr1_ref) + vr_par_ref[0:1, :]
    lane2h = jax.lax.broadcasted_iota(jnp.int32, (1, 2 * h), 1)
    vr = _seg_ln_elu(vr_pre, vr_par_ref[1:2, :], vr_par_ref[2:3, :],
                     lane2h < h, 1.0 / h)

    # Fused heads: [v | r] @ blockdiag(w_v2, w_r2), zero-padded to a 128-lane
    # multiple. Columns [0, num_buckets) are value logits, column num_buckets
    # is the risk prediction, remaining columns are zero.
    head = mm(vr, w_head_ref)
    nb_pad = head.shape[-1]
    lane = jax.lax.broadcasted_iota(jnp.int32, (1, nb_pad), 1)

    # Softmax over the bucket logits + expected value, without materializing
    # probs: value = sum(e * buckets) / sum(e) (exact divide, (tm, 1) wide).
    logit = jnp.where(lane < num_buckets, head, -jnp.inf)
    m = jnp.max(logit, axis=-1, keepdims=True)
    e = jnp.exp(logit - m)                       # masked lanes -> exactly 0
    den = jnp.sum(e, axis=-1, keepdims=True)
    num = jnp.sum(e * buckets_ref[...], axis=-1, keepdims=True)
    value = num / den

    risk = jnp.sum(jnp.where(lane == num_buckets, head, 0.0),
                   axis=-1, keepdims=True)

    # Single fused (tm, 2) store: col 0 = value, col 1 = risk.
    lane2 = jax.lax.broadcasted_iota(jnp.int32, (1, 2), 1)
    out_ref[...] = jnp.where(lane2 == 0, value, risk).astype(out_ref.dtype)


def _round_up(x, m):
    return (x + m - 1) // m * m


def _round_down(x, m):
    return x // m * m


def _choose_tile(n, block_rows):
    """Pick (tm, n_pad): tm multiple of 8, >=2 grid steps when the batch
    allows (v7x megacore), and prefer a tile that divides the 8-aligned batch
    exactly so no full jnp.pad copy of obs/act is needed."""
    n8 = _round_up(max(n, 1), 8)
    cap = max(8, min(_round_down(max(block_rows, 8), 8), n8))
    if n8 >= 16:                                    # allow >= 2 grid steps
        cap = min(cap, max(8, _round_down(n8 // 2, 8)))
    # largest multiple of 8 <= cap that divides n8 (always exists: 8 | n8)
    tm_div = next(c for c in range(cap, 7, -8) if n8 % c == 0)
    if tm_div * 4 >= cap:          # close enough to cap: skip the pad copy
        return tm_div, n8
    return cap, _round_up(n8, cap)  # otherwise accept padding for big tiles


def pack_critic_params(p, matmul_dtype=None):
    """Host-side packing of torch-layout params into kernel-ready arrays."""
    h = p["w_f2"].shape[0]
    nb = p["w_v2"].shape[1]
    nb_pad = _round_up(nb + 1, 128)   # value logits + 1 risk column, lane-padded

    w_c1f, w_c1a = p["w_c1"][:h], p["w_c1"][h:]
    w_vr1 = jnp.concatenate([p["w_v1"], p["w_r1"]], axis=1)       # (h, 2h)
    w_head = jnp.zeros((2 * h, nb_pad), jnp.float32)              # blockdiag
    w_head = w_head.at[:h, :nb].set(p["w_v2"].astype(jnp.float32))
    w_head = w_head.at[h:, nb].set(p["w_r2"][:, 0].astype(jnp.float32))

    def w(x):
        return x.astype(matmul_dtype) if matmul_dtype is not None \
            else x.astype(jnp.float32)

    bias4 = jnp.stack([p["b_f1"], p["b_f2"], p["b_c1"], p["b_c2"]]).astype(jnp.float32)
    gamma4 = jnp.stack([p["g_f1"], p["g_f2"], p["g_c1"], p["g_c2"]]).astype(jnp.float32)
    beta4 = jnp.stack([p["be_f1"], p["be_f2"], p["be_c1"], p["be_c2"]]).astype(jnp.float32)
    a_par = jnp.stack([p["b_a1"], p["g_a1"], p["be_a1"]]).astype(jnp.float32)
    vr_par = jnp.stack([jnp.concatenate([p["b_v1"], p["b_r1"]]),
                        jnp.concatenate([p["g_v1"], p["g_r1"]]),
                        jnp.concatenate([p["be_v1"], p["be_r1"]])]).astype(jnp.float32)

    # bucket values: sign(x) * (exp(|x|) - 1), x = linspace(-20, 20, nb)
    x = jnp.linspace(-20.0, 20.0, nb, dtype=jnp.float32)
    buckets = jnp.sign(x) * (jnp.exp(jnp.abs(x)) - 1.0)
    buckets = jnp.pad(buckets, (0, nb_pad - nb)).reshape(1, nb_pad)

    return dict(
        weights=tuple(w(t) for t in (p["w_f1"], p["w_f2"], p["w_a1"],
                                     w_c1f, w_c1a, p["w_c2"], w_vr1, w_head)),
        small=(bias4, gamma4, beta4, a_par, vr_par, buckets),
        num_buckets=nb,
        matmul_dtype=matmul_dtype,
    )


def critic_forward(obs, action, packed, *, block_rows=1024):
    """Fused CriticNetwork.forward. Returns (value, risk), shapes (..., 1)."""
    lead = obs.shape[:-1]
    obs2 = obs.reshape(-1, obs.shape[-1])
    act2 = action.reshape(-1, action.shape[-1])
    n = obs2.shape[0]

    tm, n_pad = _choose_tile(n, block_rows)

    mdt = packed.get("matmul_dtype")
    if mdt is not None:             # halve HBM/DMA bytes for streamed inputs
        obs2 = obs2.astype(mdt)
        act2 = act2.astype(mdt)
    if n_pad != n:
        obs2 = jnp.pad(obs2, ((0, n_pad - n), (0, 0)))
        act2 = jnp.pad(act2, ((0, n_pad - n), (0, 0)))

    obs_dim = obs2.shape[-1]
    act_dim = act2.shape[-1]
    weights = packed["weights"]
    small = packed["small"]

    def resident(arr):  # full-array block, same index every step -> no re-DMA
        return pl.BlockSpec(arr.shape, lambda i: (0, 0))

    grid_spec = pltpu.PrefetchScalarGridSpec(
        num_scalar_prefetch=0,
        grid=(n_pad // tm,),
        in_specs=[pl.BlockSpec((tm, obs_dim), lambda i: (i, 0)),
                  pl.BlockSpec((tm, act_dim), lambda i: (i, 0))]
                 + [resident(w) for w in weights]
                 + [resident(s) for s in small],
        out_specs=pl.BlockSpec((tm, 2), lambda i: (i, 0)),
    )

    out = pl.pallas_call(
        functools.partial(_critic_kernel, num_buckets=packed["num_buckets"]),
        out_shape=jax.ShapeDtypeStruct((n_pad, 2), jnp.float32),
        grid_spec=grid_spec,
        compiler_params=pltpu.CompilerParams(
            dimension_semantics=("parallel",)),
    )(obs2, act2, *weights, *small)

    value = out[:n, 0:1].reshape(lead + (1,))
    risk = out[:n, 1:2].reshape(lead + (1,))
    return value, risk


def init_critic_params(key, obs_dim, action_dim, hidden_dim=32, num_buckets=255,
                       dtype=jnp.float32, zero_init_heads=False):
    """Torch-equivalent parameters, weights stored (in, out)."""
    h, h2 = hidden_dim, hidden_dim // 2
    ks = list(jax.random.split(key, 32))
    ki = iter(ks)

    def lin_w(k, fan_in, fan_out):
        s = 1.0 / (fan_in ** 0.5)
        return jax.random.uniform(k, (fan_in, fan_out), dtype, -s, s)

    p = {}

    def block(name, fan_in, fan_out):
        p[f"w_{name}"] = lin_w(next(ki), fan_in, fan_out)
        p[f"b_{name}"] = 0.1 * jax.random.normal(next(ki), (fan_out,), dtype)
        # randomized LN affine (torch defaults to ones/zeros) so the test
        # actually exercises gamma/beta.
        p[f"g_{name}"] = 1.0 + 0.1 * jax.random.normal(next(ki), (fan_out,), dtype)
        p[f"be_{name}"] = 0.1 * jax.random.normal(next(ki), (fan_out,), dtype)

    block("f1", obs_dim, h)
    block("f2", h, h)
    block("a1", action_dim, h2)
    block("c1", h + h2, h)
    block("c2", h, h)
    block("v1", h, h)
    block("r1", h, h)
    if zero_init_heads:  # Dreamer v3 zero-init of the output head weights
        p["w_v2"] = jnp.zeros((h, num_buckets), dtype)
        p["w_r2"] = jnp.zeros((h, 1), dtype)
    else:
        p["w_v2"] = lin_w(next(ki), h, num_buckets)
        p["w_r2"] = lin_w(next(ki), h, 1)
    return p


def critic_forward_ref(obs, action, p):
    """Pure-JAX reference of the same forward pass (for verification)."""
    def ln_elu(x, gamma, beta):
        mu = jnp.mean(x, axis=-1, keepdims=True)
        var = jnp.mean(jnp.square(x - mu), axis=-1, keepdims=True)
        y = (x - mu) / jnp.sqrt(var + _LN_EPS) * gamma + beta
        return jnp.where(y > 0.0, y, jnp.exp(jnp.minimum(y, 0.0)) - 1.0)

    f = ln_elu(obs @ p["w_f1"] + p["b_f1"], p["g_f1"], p["be_f1"])
    f = ln_elu(f @ p["w_f2"] + p["b_f2"], p["g_f2"], p["be_f2"])
    a = ln_elu(action @ p["w_a1"] + p["b_a1"], p["g_a1"], p["be_a1"])
    comb = jnp.concatenate([f, a], axis=-1)
    c = ln_elu(comb @ p["w_c1"] + p["b_c1"], p["g_c1"], p["be_c1"])
    c = ln_elu(c @ p["w_c2"] + p["b_c2"], p["g_c2"], p["be_c2"])
    v = ln_elu(c @ p["w_v1"] + p["b_v1"], p["g_v1"], p["be_v1"])
    logits = v @ p["w_v2"]
    r = ln_elu(c @ p["w_r1"] + p["b_r1"], p["g_r1"], p["be_r1"])
    risk = r @ p["w_r2"]
    nb = p["w_v2"].shape[1]
    x = jnp.linspace(-20.0, 20.0, nb, dtype=jnp.float32)
    buckets = jnp.sign(x) * (jnp.exp(jnp.abs(x)) - 1.0)
    probs = jax.nn.softmax(logits, axis=-1)
    value = jnp.sum(probs * buckets, axis=-1, keepdims=True)
    return value, risk, probs, buckets


if __name__ == "__main__":
    key = jax.random.PRNGKey(0)
    obs_dim, action_dim, hidden_dim, num_buckets = 32, 8, 32, 255

    kp, ko, ka, ko2, ka2 = jax.random.split(key, 5)
    # NOTE: zero_init_heads=False so the head matmul path is actually exercised;
    # the original module zero-inits the final head weights (a param-init choice).
    params = init_critic_params(kp, obs_dim, action_dim, hidden_dim, num_buckets)
    packed = pack_critic_params(params)

    def check(obs, action):
        value, risk = critic_forward(obs, action, packed)
        value, risk = jax.block_until_ready((value, risk))
        v_ref, r_ref, probs_ref, buckets = critic_forward_ref(obs, action, params)
        assert value.shape == obs.shape[:-1] + (1,) and risk.shape == value.shape
        # value is an expectation over exponentially-spaced bucket values
        # (|v| up to ~4.9e8); scale the tolerance by the per-row magnitude.
        scale = jnp.sum(probs_ref * jnp.abs(buckets), axis=-1, keepdims=True)
        assert bool(jnp.all(jnp.abs(value - v_ref) <= 1e-4 * scale + 1e-3)), "value mismatch"
        assert bool(jnp.all(jnp.abs(risk - r_ref) <= 1e-4 + 1e-4 * jnp.abs(r_ref))), "risk mismatch"

    # 3-D (B, T, feat) inputs: 16 rows -> two 8-row tiles (multi-step parallel grid)
    obs3 = jax.random.normal(ko, (2, 8, obs_dim), jnp.float32)
    act3 = jax.random.normal(ka, (2, 8, action_dim), jnp.float32)
    check(obs3, act3)

    # 2-D inputs with a batch not a multiple of 8 (exercises pad + crop path)
    obs2d = jax.random.normal(ko2, (12, obs_dim), jnp.float32)
    act2d = jax.random.normal(ka2, (12, action_dim), jnp.float32)
    check(obs2d, act2d)

    # Optional bf16 streaming path (matmul operands only): smoke test.
    packed_bf16 = pack_critic_params(params, matmul_dtype=jnp.bfloat16)
    v_bf, r_bf = jax.block_until_ready(critic_forward(obs3, act3, packed_bf16))
    assert bool(jnp.all(jnp.isfinite(v_bf))) and bool(jnp.all(jnp.isfinite(r_bf)))

    print("KERNEL_OK")
</pallas_src>

<mosaic_0001>
module attributes {stable_mosaic.version = 11 : i64} {
  func.func @_critic_kernel(%arg0: i32, %arg1: memref<8x32xf32, #tpu.memory_space<vmem>>, %arg2: memref<8x8xf32, #tpu.memory_space<vmem>>, %arg3: memref<32x32xf32, #tpu.memory_space<vmem>>, %arg4: memref<32x32xf32, #tpu.memory_space<vmem>>, %arg5: memref<8x16xf32, #tpu.memory_space<vmem>>, %arg6: memref<32x32xf32, #tpu.memory_space<vmem>>, %arg7: memref<16x32xf32, #tpu.memory_space<vmem>>, %arg8: memref<32x32xf32, #tpu.memory_space<vmem>>, %arg9: memref<32x64xf32, #tpu.memory_space<vmem>>, %arg10: memref<64x256xf32, #tpu.memory_space<vmem>>, %arg11: memref<4x32xf32, #tpu.memory_space<vmem>>, %arg12: memref<4x32xf32, #tpu.memory_space<vmem>>, %arg13: memref<4x32xf32, #tpu.memory_space<vmem>>, %arg14: memref<3x16xf32, #tpu.memory_space<vmem>>, %arg15: memref<3x64xf32, #tpu.memory_space<vmem>>, %arg16: memref<1x256xf32, #tpu.memory_space<vmem>>, %arg17: memref<8x2xf32, #tpu.memory_space<vmem>>) attributes {dimension_semantics = [#tpu.dimension_semantics<parallel>], iteration_bounds = array<i64: 2>, scalar_prefetch = 0 : i64, scratch_operands = 0 : i64, tpu.core_type = #tpu.core_type<tc>, window_params = [{transform_indices = @transform_0, window_bounds = array<i64: 8, 32>}, {transform_indices = @transform_1, window_bounds = array<i64: 8, 8>}, {pipeline_mode = #tpu.pipeline_mode<synchronous>, transform_indices = @transform_2, window_bounds = array<i64: 32, 32>}, {pipeline_mode = #tpu.pipeline_mode<synchronous>, transform_indices = @transform_3, window_bounds = array<i64: 32, 32>}, {pipeline_mode = #tpu.pipeline_mode<synchronous>, transform_indices = @transform_4, window_bounds = array<i64: 8, 16>}, {pipeline_mode = #tpu.pipeline_mode<synchronous>, transform_indices = @transform_5, window_bounds = array<i64: 32, 32>}, {pipeline_mode = #tpu.pipeline_mode<synchronous>, transform_indices = @transform_6, window_bounds = array<i64: 16, 32>}, {pipeline_mode = #tpu.pipeline_mode<synchronous>, transform_indices = @transform_7, window_bounds = array<i64: 32, 32>}, {pipeline_mode = #tpu.pipeline_mode<synchronous>, transform_indices = @transform_8, window_bounds = array<i64: 32, 64>}, {pipeline_mode = #tpu.pipeline_mode<synchronous>, transform_indices = @transform_9, window_bounds = array<i64: 64, 256>}, {pipeline_mode = #tpu.pipeline_mode<synchronous>, transform_indices = @transform_10, window_bounds = array<i64: 4, 32>}, {pipeline_mode = #tpu.pipeline_mode<synchronous>, transform_indices = @transform_11, window_bounds = array<i64: 4, 32>}, {pipeline_mode = #tpu.pipeline_mode<synchronous>, transform_indices = @transform_12, window_bounds = array<i64: 4, 32>}, {pipeline_mode = #tpu.pipeline_mode<synchronous>, transform_indices = @transform_13, window_bounds = array<i64: 3, 16>}, {pipeline_mode = #tpu.pipeline_mode<synchronous>, transform_indices = @transform_14, window_bounds = array<i64: 3, 64>}, {pipeline_mode = #tpu.pipeline_mode<synchronous>, transform_indices = @transform_15, window_bounds = array<i64: 1, 256>}, {transform_indices = @transform_16, window_bounds = array<i64: 8, 2>}]} {
    %c0 = arith.constant 0 : index
    %c0_0 = arith.constant 0 : index
    %0 = vector.load %arg1[%c0, %c0_0] : memref<8x32xf32, #tpu.memory_space<vmem>>, vector<8x32xf32>
    %c0_1 = arith.constant 0 : index
    %c0_2 = arith.constant 0 : index
    %1 = vector.load %arg2[%c0_1, %c0_2] : memref<8x8xf32, #tpu.memory_space<vmem>>, vector<8x8xf32>
    %c0_3 = arith.constant 0 : index
    %c0_4 = arith.constant 0 : index
    %2 = vector.load %arg3[%c0_3, %c0_4] : memref<32x32xf32, #tpu.memory_space<vmem>>, vector<32x32xf32>
    %cst = arith.constant dense<0.000000e+00> : vector<8x32xf32>
    %3 = tpu.matmul %0, %2, %cst {dimension_numbers = #tpu.dot_dimension_numbers<[1], [0], [0], [1], [0, 0, 1, 1], [], []>} : vector<8x32xf32>, vector<32x32xf32>, vector<8x32xf32> -> vector<8x32xf32>
    %c0_5 = arith.constant 0 : index
    %c0_6 = arith.constant 0 : index
    %4 = vector.load %arg11[%c0_5, %c0_6] : memref<4x32xf32, #tpu.memory_space<vmem>>, vector<1x32xf32>
    %5 = vector.broadcast %4 : vector<1x32xf32> to vector<8x32xf32>
    %6 = arith.addf %3, %5 : vector<8x32xf32>
    %c0_7 = arith.constant 0 : index
    %c0_8 = arith.constant 0 : index
    %7 = vector.load %arg12[%c0_7, %c0_8] : memref<4x32xf32, #tpu.memory_space<vmem>>, vector<1x32xf32>
    %c0_9 = arith.constant 0 : index
    %c0_10 = arith.constant 0 : index
    %8 = vector.load %arg13[%c0_9, %c0_10] : memref<4x32xf32, #tpu.memory_space<vmem>>, vector<1x32xf32>
    %cst_11 = arith.constant dense<0.000000e+00> : vector<8xf32>
    %9 = vector.multi_reduction <add>, %6, %cst_11 [1] : vector<8x32xf32> to vector<8xf32>
    %10 = vector.shape_cast %9 : vector<8xf32> to vector<8x1xf32>
    %cst_12 = arith.constant 3.200000e+01 : f32
    %11 = vector.broadcast %cst_12 : f32 to vector<8x1xf32>
    %12 = arith.divf %10, %11 : vector<8x1xf32>
    %13 = vector.broadcast %12 : vector<8x1xf32> to vector<8x32xf32>
    %14 = arith.subf %6, %13 : vector<8x32xf32>
    %15 = arith.mulf %14, %14 : vector<8x32xf32>
    %cst_13 = arith.constant dense<0.000000e+00> : vector<8xf32>
    %16 = vector.multi_reduction <add>, %15, %cst_13 [1] : vector<8x32xf32> to vector<8xf32>
    %17 = vector.shape_cast %16 : vector<8xf32> to vector<8x1xf32>
    %cst_14 = arith.constant 3.200000e+01 : f32
    %18 = vector.broadcast %cst_14 : f32 to vector<8x1xf32>
    %19 = arith.divf %17, %18 : vector<8x1xf32>
    %20 = vector.broadcast %12 : vector<8x1xf32> to vector<8x32xf32>
    %21 = arith.subf %6, %20 : vector<8x32xf32>
    %cst_15 = arith.constant 9.99999974E-6 : f32
    %22 = vector.broadcast %cst_15 : f32 to vector<8x1xf32>
    %23 = arith.addf %19, %22 : vector<8x1xf32>
    %24 = math.rsqrt %23 : vector<8x1xf32>
    %25 = vector.broadcast %24 : vector<8x1xf32> to vector<8x32xf32>
    %26 = arith.mulf %21, %25 : vector<8x32xf32>
    %27 = vector.broadcast %7 : vector<1x32xf32> to vector<8x32xf32>
    %28 = arith.mulf %26, %27 : vector<8x32xf32>
    %29 = vector.broadcast %8 : vector<1x32xf32> to vector<8x32xf32>
    %30 = arith.addf %28, %29 : vector<8x32xf32>
    %cst_16 = arith.constant 0.000000e+00 : f32
    %31 = vector.broadcast %cst_16 : f32 to vector<8x32xf32>
    %32 = arith.cmpf ogt, %30, %31 : vector<8x32xf32>
    %cst_17 = arith.constant 0.000000e+00 : f32
    %33 = vector.broadcast %cst_17 : f32 to vector<8x32xf32>
    %34 = arith.minimumf %30, %33 : vector<8x32xf32>
    %35 = math.exp %34 : vector<8x32xf32>
    %cst_18 = arith.constant 1.000000e+00 : f32
    %36 = vector.broadcast %cst_18 : f32 to vector<8x32xf32>
    %37 = arith.subf %35, %36 : vector<8x32xf32>
    %38 = arith.select %32, %30, %37 : vector<8x32xi1>, vector<8x32xf32>
    %c0_19 = arith.constant 0 : index
    %c0_20 = arith.constant 0 : index
    %39 = vector.load %arg4[%c0_19, %c0_20] : memref<32x32xf32, #tpu.memory_space<vmem>>, vector<32x32xf32>
    %cst_21 = arith.constant dense<0.000000e+00> : vector<8x32xf32>
    %40 = tpu.matmul %38, %39, %cst_21 {dimension_numbers = #tpu.dot_dimension_numbers<[1], [0], [0], [1], [0, 0, 1, 1], [], []>} : vector<8x32xf32>, vector<32x32xf32>, vector<8x32xf32> -> vector<8x32xf32>
    %c1 = arith.constant 1 : index
    %c0_22 = arith.constant 0 : index
    %41 = vector.load %arg11[%c1, %c0_22] : memref<4x32xf32, #tpu.memory_space<vmem>>, vector<1x32xf32>
    %42 = vector.broadcast %41 : vector<1x32xf32> to vector<8x32xf32>
    %43 = arith.addf %40, %42 : vector<8x32xf32>
    %c1_23 = arith.constant 1 : index
    %c0_24 = arith.constant 0 : index
    %44 = vector.load %arg12[%c1_23, %c0_24] : memref<4x32xf32, #tpu.memory_space<vmem>>, vector<1x32xf32>
    %c1_25 = arith.constant 1 : index
    %c0_26 = arith.constant 0 : index
    %45 = vector.load %arg13[%c1_25, %c0_26] : memref<4x32xf32, #tpu.memory_space<vmem>>, vector<1x32xf32>
    %cst_27 = arith.constant dense<0.000000e+00> : vector<8xf32>
    %46 = vector.multi_reduction <add>, %43, %cst_27 [1] : vector<8x32xf32> to vector<8xf32>
    %47 = vector.shape_cast %46 : vector<8xf32> to vector<8x1xf32>
    %cst_28 = arith.constant 3.200000e+01 : f32
    %48 = vector.broadcast %cst_28 : f32 to vector<8x1xf32>
    %49 = arith.divf %47, %48 : vector<8x1xf32>
    %50 = vector.broadcast %49 : vector<8x1xf32> to vector<8x32xf32>
    %51 = arith.subf %43, %50 : vector<8x32xf32>
    %52 = arith.mulf %51, %51 : vector<8x32xf32>
    %cst_29 = arith.constant dense<0.000000e+00> : vector<8xf32>
    %53 = vector.multi_reduction <add>, %52, %cst_29 [1] : vector<8x32xf32> to vector<8xf32>
    %54 = vector.shape_cast %53 : vector<8xf32> to vector<8x1xf32>
    %cst_30 = arith.constant 3.200000e+01 : f32
    %55 = vector.broadcast %cst_30 : f32 to vector<8x1xf32>
    %56 = arith.divf %54, %55 : vector<8x1xf32>
    %57 = vector.broadcast %49 : vector<8x1xf32> to vector<8x32xf32>
    %58 = arith.subf %43, %57 : vector<8x32xf32>
    %cst_31 = arith.constant 9.99999974E-6 : f32
    %59 = vector.broadcast %cst_31 : f32 to vector<8x1xf32>
    %60 = arith.addf %56, %59 : vector<8x1xf32>
    %61 = math.rsqrt %60 : vector<8x1xf32>
    %62 = vector.broadcast %61 : vector<8x1xf32> to vector<8x32xf32>
    %63 = arith.mulf %58, %62 : vector<8x32xf32>
    %64 = vector.broadcast %44 : vector<1x32xf32> to vector<8x32xf32>
    %65 = arith.mulf %63, %64 : vector<8x32xf32>
    %66 = vector.broadcast %45 : vector<1x32xf32> to vector<8x32xf32>
    %67 = arith.addf %65, %66 : vector<8x32xf32>
    %cst_32 = arith.constant 0.000000e+00 : f32
    %68 = vector.broadcast %cst_32 : f32 to vector<8x32xf32>
    %69 = arith.cmpf ogt, %67, %68 : vector<8x32xf32>
    %cst_33 = arith.constant 0.000000e+00 : f32
    %70 = vector.broadcast %cst_33 : f32 to vector<8x32xf32>
    %71 = arith.minimumf %67, %70 : vector<8x32xf32>
    %72 = math.exp %71 : vector<8x32xf32>
    %cst_34 = arith.constant 1.000000e+00 : f32
    %73 = vector.broadcast %cst_34 : f32 to vector<8x32xf32>
    %74 = arith.subf %72, %73 : vector<8x32xf32>
    %75 = arith.select %69, %67, %74 : vector<8x32xi1>, vector<8x32xf32>
    %c0_35 = arith.constant 0 : index
    %c0_36 = arith.constant 0 : index
    %76 = vector.load %arg5[%c0_35, %c0_36] : memref<8x16xf32, #tpu.memory_space<vmem>>, vector<8x16xf32>
    %cst_37 = arith.constant dense<0.000000e+00> : vector<8x16xf32>
    %77 = tpu.matmul %1, %76, %cst_37 {dimension_numbers = #tpu.dot_dimension_numbers<[1], [0], [0], [1], [0, 0, 1, 1], [], []>} : vector<8x8xf32>, vector<8x16xf32>, vector<8x16xf32> -> vector<8x16xf32>
    %c0_38 = arith.constant 0 : index
    %c0_39 = arith.constant 0 : index
    %78 = vector.load %arg14[%c0_38, %c0_39] : memref<3x16xf32, #tpu.memory_space<vmem>>, vector<1x16xf32>
    %79 = vector.broadcast %78 : vector<1x16xf32> to vector<8x16xf32>
    %80 = arith.addf %77, %79 : vector<8x16xf32>
    %c1_40 = arith.constant 1 : index
    %c0_41 = arith.constant 0 : index
    %81 = vector.load %arg14[%c1_40, %c0_41] : memref<3x16xf32, #tpu.memory_space<vmem>>, vector<1x16xf32>
    %c2 = arith.constant 2 : index
    %c0_42 = arith.constant 0 : index
    %82 = vector.load %arg14[%c2, %c0_42] : memref<3x16xf32, #tpu.memory_space<vmem>>, vector<1x16xf32>
    %cst_43 = arith.constant dense<0.000000e+00> : vector<8xf32>
    %83 = vector.multi_reduction <add>, %80, %cst_43 [1] : vector<8x16xf32> to vector<8xf32>
    %84 = vector.shape_cast %83 : vector<8xf32> to vector<8x1xf32>
    %cst_44 = arith.constant 1.600000e+01 : f32
    %85 = vector.broadcast %cst_44 : f32 to vector<8x1xf32>
    %86 = arith.divf %84, %85 : vector<8x1xf32>
    %87 = vector.broadcast %86 : vector<8x1xf32> to vector<8x16xf32>
    %88 = arith.subf %80, %87 : vector<8x16xf32>
    %89 = arith.mulf %88, %88 : vector<8x16xf32>
    %cst_45 = arith.constant dense<0.000000e+00> : vector<8xf32>
    %90 = vector.multi_reduction <add>, %89, %cst_45 [1] : vector<8x16xf32> to vector<8xf32>
    %91 = vector.shape_cast %90 : vector<8xf32> to vector<8x1xf32>
    %cst_46 = arith.constant 1.600000e+01 : f32
    %92 = vector.broadcast %cst_46 : f32 to vector<8x1xf32>
    %93 = arith.divf %91, %92 : vector<8x1xf32>
    %94 = vector.broadcast %86 : vector<8x1xf32> to vector<8x16xf32>
    %95 = arith.subf %80, %94 : vector<8x16xf32>
    %cst_47 = arith.constant 9.99999974E-6 : f32
    %96 = vector.broadcast %cst_47 : f32 to vector<8x1xf32>
    %97 = arith.addf %93, %96 : vector<8x1xf32>
    %98 = math.rsqrt %97 : vector<8x1xf32>
    %99 = vector.broadcast %98 : vector<8x1xf32> to vector<8x16xf32>
    %100 = arith.mulf %95, %99 : vector<8x16xf32>
    %101 = vector.broadcast %81 : vector<1x16xf32> to vector<8x16xf32>
    %102 = arith.mulf %100, %101 : vector<8x16xf32>
    %103 = vector.broadcast %82 : vector<1x16xf32> to vector<8x16xf32>
    %104 = arith.addf %102, %103 : vector<8x16xf32>
    %cst_48 = arith.constant 0.000000e+00 : f32
    %105 = vector.broadcast %cst_48 : f32 to vector<8x16xf32>
    %106 = arith.cmpf ogt, %104, %105 : vector<8x16xf32>
    %cst_49 = arith.constant 0.000000e+00 : f32
    %107 = vector.broadcast %cst_49 : f32 to vector<8x16xf32>
    %108 = arith.minimumf %104, %107 : vector<8x16xf32>
    %109 = math.exp %108 : vector<8x16xf32>
    %cst_50 = arith.constant 1.000000e+00 : f32
    %110 = vector.broadcast %cst_50 : f32 to vector<8x16xf32>
    %111 = arith.subf %109, %110 : vector<8x16xf32>
    %112 = arith.select %106, %104, %111 : vector<8x16xi1>, vector<8x16xf32>
    %c0_51 = arith.constant 0 : index
    %c0_52 = arith.constant 0 : index
    %113 = vector.load %arg6[%c0_51, %c0_52] : memref<32x32xf32, #tpu.memory_space<vmem>>, vector<32x32xf32>
    %cst_53 = arith.constant dense<0.000000e+00> : vector<8x32xf32>
    %114 = tpu.matmul %75, %113, %cst_53 {dimension_numbers = #tpu.dot_dimension_numbers<[1], [0], [0], [1], [0, 0, 1, 1], [], []>} : vector<8x32xf32>, vector<32x32xf32>, vector<8x32xf32> -> vector<8x32xf32>
    %c0_54 = arith.constant 0 : index
    %c0_55 = arith.constant 0 : index
    %115 = vector.load %arg7[%c0_54, %c0_55] : memref<16x32xf32, #tpu.memory_space<vmem>>, vector<16x32xf32>
    %cst_56 = arith.constant dense<0.000000e+00> : vector<8x32xf32>
    %116 = tpu.matmul %112, %115, %cst_56 {dimension_numbers = #tpu.dot_dimension_numbers<[1], [0], [0], [1], [0, 0, 1, 1], [], []>} : vector<8x16xf32>, vector<16x32xf32>, vector<8x32xf32> -> vector<8x32xf32>
    %117 = arith.addf %114, %116 : vector<8x32xf32>
    %c2_57 = arith.constant 2 : index
    %c0_58 = arith.constant 0 : index
    %118 = vector.load %arg11[%c2_57, %c0_58] : memref<4x32xf32, #tpu.memory_space<vmem>>, vector<1x32xf32>
    %119 = vector.broadcast %118 : vector<1x32xf32> to vector<8x32xf32>
    %120 = arith.addf %117, %119 : vector<8x32xf32>
    %c2_59 = arith.constant 2 : index
    %c0_60 = arith.constant 0 : index
    %121 = vector.load %arg12[%c2_59, %c0_60] : memref<4x32xf32, #tpu.memory_space<vmem>>, vector<1x32xf32>
    %c2_61 = arith.constant 2 : index
    %c0_62 = arith.constant 0 : index
    %122 = vector.load %arg13[%c2_61, %c0_62] : memref<4x32xf32, #tpu.memory_space<vmem>>, vector<1x32xf32>
    %cst_63 = arith.constant dense<0.000000e+00> : vector<8xf32>
    %123 = vector.multi_reduction <add>, %120, %cst_63 [1] : vector<8x32xf32> to vector<8xf32>
    %124 = vector.shape_cast %123 : vector<8xf32> to vector<8x1xf32>
    %cst_64 = arith.constant 3.200000e+01 : f32
    %125 = vector.broadcast %cst_64 : f32 to vector<8x1xf32>
    %126 = arith.divf %124, %125 : vector<8x1xf32>
    %127 = vector.broadcast %126 : vector<8x1xf32> to vector<8x32xf32>
    %128 = arith.subf %120, %127 : vector<8x32xf32>
    %129 = arith.mulf %128, %128 : vector<8x32xf32>
    %cst_65 = arith.constant dense<0.000000e+00> : vector<8xf32>
    %130 = vector.multi_reduction <add>, %129, %cst_65 [1] : vector<8x32xf32> to vector<8xf32>
    %131 = vector.shape_cast %130 : vector<8xf32> to vector<8x1xf32>
    %cst_66 = arith.constant 3.200000e+01 : f32
    %132 = vector.broadcast %cst_66 : f32 to vector<8x1xf32>
    %133 = arith.divf %131, %132 : vector<8x1xf32>
    %134 = vector.broadcast %126 : vector<8x1xf32> to vector<8x32xf32>
    %135 = arith.subf %120, %134 : vector<8x32xf32>
    %cst_67 = arith.constant 9.99999974E-6 : f32
    %136 = vector.broadcast %cst_67 : f32 to vector<8x1xf32>
    %137 = arith.addf %133, %136 : vector<8x1xf32>
    %138 = math.rsqrt %137 : vector<8x1xf32>
    %139 = vector.broadcast %138 : vector<8x1xf32> to vector<8x32xf32>
    %140 = arith.mulf %135, %139 : vector<8x32xf32>
    %141 = vector.broadcast %121 : vector<1x32xf32> to vector<8x32xf32>
    %142 = arith.mulf %140, %141 : vector<8x32xf32>
    %143 = vector.broadcast %122 : vector<1x32xf32> to vector<8x32xf32>
    %144 = arith.addf %142, %143 : vector<8x32xf32>
    %cst_68 = arith.constant 0.000000e+00 : f32
    %145 = vector.broadcast %cst_68 : f32 to vector<8x32xf32>
    %146 = arith.cmpf ogt, %144, %145 : vector<8x32xf32>
    %cst_69 = arith.constant 0.000000e+00 : f32
    %147 = vector.broadcast %cst_69 : f32 to vector<8x32xf32>
    %148 = arith.minimumf %144, %147 : vector<8x32xf32>
    %149 = math.exp %148 : vector<8x32xf32>
    %cst_70 = arith.constant 1.000000e+00 : f32
    %150 = vector.broadcast %cst_70 : f32 to vector<8x32xf32>
    %151 = arith.subf %149, %150 : vector<8x32xf32>
    %152 = arith.select %146, %144, %151 : vector<8x32xi1>, vector<8x32xf32>
    %c0_71 = arith.constant 0 : index
    %c0_72 = arith.constant 0 : index
    %153 = vector.load %arg8[%c0_71, %c0_72] : memref<32x32xf32, #tpu.memory_space<vmem>>, vector<32x32xf32>
    %cst_73 = arith.constant dense<0.000000e+00> : vector<8x32xf32>
    %154 = tpu.matmul %152, %153, %cst_73 {dimension_numbers = #tpu.dot_dimension_numbers<[1], [0], [0], [1], [0, 0, 1, 1], [], []>} : vector<8x32xf32>, vector<32x32xf32>, vector<8x32xf32> -> vector<8x32xf32>
    %c3 = arith.constant 3 : index
    %c0_74 = arith.constant 0 : index
    %155 = vector.load %arg11[%c3, %c0_74] : memref<4x32xf32, #tpu.memory_space<vmem>>, vector<1x32xf32>
    %156 = vector.broadcast %155 : vector<1x32xf32> to vector<8x32xf32>
    %157 = arith.addf %154, %156 : vector<8x32xf32>
    %c3_75 = arith.constant 3 : index
    %c0_76 = arith.constant 0 : index
    %158 = vector.load %arg12[%c3_75, %c0_76] : memref<4x32xf32, #tpu.memory_space<vmem>>, vector<1x32xf32>
    %c3_77 = arith.constant 3 : index
    %c0_78 = arith.constant 0 : index
    %159 = vector.load %arg13[%c3_77, %c0_78] : memref<4x32xf32, #tpu.memory_space<vmem>>, vector<1x32xf32>
    %cst_79 = arith.constant dense<0.000000e+00> : vector<8xf32>
    %160 = vector.multi_reduction <add>, %157, %cst_79 [1] : vector<8x32xf32> to vector<8xf32>
    %161 = vector.shape_cast %160 : vector<8xf32> to vector<8x1xf32>
    %cst_80 = arith.constant 3.200000e+01 : f32
    %162 = vector.broadcast %cst_80 : f32 to vector<8x1xf32>
    %163 = arith.divf %161, %162 : vector<8x1xf32>
    %164 = vector.broadcast %163 : vector<8x1xf32> to vector<8x32xf32>
    %165 = arith.subf %157, %164 : vector<8x32xf32>
    %166 = arith.mulf %165, %165 : vector<8x32xf32>
    %cst_81 = arith.constant dense<0.000000e+00> : vector<8xf32>
    %167 = vector.multi_reduction <add>, %166, %cst_81 [1] : vector<8x32xf32> to vector<8xf32>
    %168 = vector.shape_cast %167 : vector<8xf32> to vector<8x1xf32>
    %cst_82 = arith.constant 3.200000e+01 : f32
    %169 = vector.broadcast %cst_82 : f32 to vector<8x1xf32>
    %170 = arith.divf %168, %169 : vector<8x1xf32>
    %171 = vector.broadcast %163 : vector<8x1xf32> to vector<8x32xf32>
    %172 = arith.subf %157, %171 : vector<8x32xf32>
    %cst_83 = arith.constant 9.99999974E-6 : f32
    %173 = vector.broadcast %cst_83 : f32 to vector<8x1xf32>
    %174 = arith.addf %170, %173 : vector<8x1xf32>
    %175 = math.rsqrt %174 : vector<8x1xf32>
    %176 = vector.broadcast %175 : vector<8x1xf32> to vector<8x32xf32>
    %177 = arith.mulf %172, %176 : vector<8x32xf32>
    %178 = vector.broadcast %158 : vector<1x32xf32> to vector<8x32xf32>
    %179 = arith.mulf %177, %178 : vector<8x32xf32>
    %180 = vector.broadcast %159 : vector<1x32xf32> to vector<8x32xf32>
    %181 = arith.addf %179, %180 : vector<8x32xf32>
    %cst_84 = arith.constant 0.000000e+00 : f32
    %182 = vector.broadcast %cst_84 : f32 to vector<8x32xf32>
    %183 = arith.cmpf ogt, %181, %182 : vector<8x32xf32>
    %cst_85 = arith.constant 0.000000e+00 : f32
    %184 = vector.broadcast %cst_85 : f32 to vector<8x32xf32>
    %185 = arith.minimumf %181, %184 : vector<8x32xf32>
    %186 = math.exp %185 : vector<8x32xf32>
    %cst_86 = arith.constant 1.000000e+00 : f32
    %187 = vector.broadcast %cst_86 : f32 to vector<8x32xf32>
    %188 = arith.subf %186, %187 : vector<8x32xf32>
    %189 = arith.select %183, %181, %188 : vector<8x32xi1>, vector<8x32xf32>
    %c0_87 = arith.constant 0 : index
    %c0_88 = arith.constant 0 : index
    %190 = vector.load %arg9[%c0_87, %c0_88] : memref<32x64xf32, #tpu.memory_space<vmem>>, vector<32x64xf32>
    %cst_89 = arith.constant dense<0.000000e+00> : vector<8x64xf32>
    %191 = tpu.matmul %189, %190, %cst_89 {dimension_numbers = #tpu.dot_dimension_numbers<[1], [0], [0], [1], [0, 0, 1, 1], [], []>} : vector<8x32xf32>, vector<32x64xf32>, vector<8x64xf32> -> vector<8x64xf32>
    %c0_90 = arith.constant 0 : index
    %c0_91 = arith.constant 0 : index
    %192 = vector.load %arg15[%c0_90, %c0_91] : memref<3x64xf32, #tpu.memory_space<vmem>>, vector<1x64xf32>
    %193 = vector.broadcast %192 : vector<1x64xf32> to vector<8x64xf32>
    %194 = arith.addf %191, %193 : vector<8x64xf32>
    %195 = tpu.iota {dimensions = array<i32: 1>} : vector<1x64xi32>
    %c1_92 = arith.constant 1 : index
    %c0_93 = arith.constant 0 : index
    %196 = vector.load %arg15[%c1_92, %c0_93] : memref<3x64xf32, #tpu.memory_space<vmem>>, vector<1x64xf32>
    %c2_94 = arith.constant 2 : index
    %c0_95 = arith.constant 0 : index
    %197 = vector.load %arg15[%c2_94, %c0_95] : memref<3x64xf32, #tpu.memory_space<vmem>>, vector<1x64xf32>
    %c32_i32 = arith.constant 32 : i32
    %198 = vector.broadcast %c32_i32 : i32 to vector<1x64xi32>
    %199 = arith.cmpi slt, %195, %198 : vector<1x64xi32>
    %cst_96 = arith.constant 0.000000e+00 : f32
    %200 = vector.shape_cast %199 : vector<1x64xi1> to vector<1x64xi1>
    %201 = vector.broadcast %200 : vector<1x64xi1> to vector<8x64xi1>
    %202 = vector.broadcast %cst_96 : f32 to vector<8x64xf32>
    %203 = arith.select %201, %194, %202 : vector<8x64xi1>, vector<8x64xf32>
    %cst_97 = arith.constant dense<0.000000e+00> : vector<8xf32>
    %204 = vector.multi_reduction <add>, %203, %cst_97 [1] : vector<8x64xf32> to vector<8xf32>
    %205 = vector.shape_cast %204 : vector<8xf32> to vector<8x1xf32>
    %cst_98 = arith.constant 0.000000e+00 : f32
    %206 = vector.shape_cast %199 : vector<1x64xi1> to vector<1x64xi1>
    %207 = vector.broadcast %206 : vector<1x64xi1> to vector<8x64xi1>
    %208 = vector.broadcast %cst_98 : f32 to vector<8x64xf32>
    %209 = arith.select %207, %208, %194 : vector<8x64xi1>, vector<8x64xf32>
    %cst_99 = arith.constant dense<0.000000e+00> : vector<8xf32>
    %210 = vector.multi_reduction <add>, %209, %cst_99 [1] : vector<8x64xf32> to vector<8xf32>
    %211 = vector.shape_cast %210 : vector<8xf32> to vector<8x1xf32>
    %212 = vector.shape_cast %199 : vector<1x64xi1> to vector<1x64xi1>
    %213 = vector.broadcast %212 : vector<1x64xi1> to vector<8x64xi1>
    %214 = vector.shape_cast %205 : vector<8x1xf32> to vector<8x1xf32>
    %215 = vector.broadcast %214 : vector<8x1xf32> to vector<8x64xf32>
    %216 = vector.shape_cast %211 : vector<8x1xf32> to vector<8x1xf32>
    %217 = vector.broadcast %216 : vector<8x1xf32> to vector<8x64xf32>
    %218 = arith.select %213, %215, %217 : vector<8x64xi1>, vector<8x64xf32>
    %cst_100 = arith.constant 3.125000e-02 : f32
    %219 = vector.broadcast %cst_100 : f32 to vector<8x64xf32>
    %220 = arith.mulf %218, %219 : vector<8x64xf32>
    %221 = arith.subf %194, %220 : vector<8x64xf32>
    %222 = arith.mulf %221, %221 : vector<8x64xf32>
    %cst_101 = arith.constant 0.000000e+00 : f32
    %223 = vector.shape_cast %199 : vector<1x64xi1> to vector<1x64xi1>
    %224 = vector.broadcast %223 : vector<1x64xi1> to vector<8x64xi1>
    %225 = vector.broadcast %cst_101 : f32 to vector<8x64xf32>
    %226 = arith.select %224, %222, %225 : vector<8x64xi1>, vector<8x64xf32>
    %cst_102 = arith.constant dense<0.000000e+00> : vector<8xf32>
    %227 = vector.multi_reduction <add>, %226, %cst_102 [1] : vector<8x64xf32> to vector<8xf32>
    %228 = vector.shape_cast %227 : vector<8xf32> to vector<8x1xf32>
    %cst_103 = arith.constant 0.000000e+00 : f32
    %229 = vector.shape_cast %199 : vector<1x64xi1> to vector<1x64xi1>
    %230 = vector.broadcast %229 : vector<1x64xi1> to vector<8x64xi1>
    %231 = vector.broadcast %cst_103 : f32 to vector<8x64xf32>
    %232 = arith.select %230, %231, %222 : vector<8x64xi1>, vector<8x64xf32>
    %cst_104 = arith.constant dense<0.000000e+00> : vector<8xf32>
    %233 = vector.multi_reduction <add>, %232, %cst_104 [1] : vector<8x64xf32> to vector<8xf32>
    %234 = vector.shape_cast %233 : vector<8xf32> to vector<8x1xf32>
    %235 = vector.shape_cast %199 : vector<1x64xi1> to vector<1x64xi1>
    %236 = vector.broadcast %235 : vector<1x64xi1> to vector<8x64xi1>
    %237 = vector.shape_cast %228 : vector<8x1xf32> to vector<8x1xf32>
    %238 = vector.broadcast %237 : vector<8x1xf32> to vector<8x64xf32>
    %239 = vector.shape_cast %234 : vector<8x1xf32> to vector<8x1xf32>
    %240 = vector.broadcast %239 : vector<8x1xf32> to vector<8x64xf32>
    %241 = arith.select %236, %238, %240 : vector<8x64xi1>, vector<8x64xf32>
    %cst_105 = arith.constant 3.125000e-02 : f32
    %242 = vector.broadcast %cst_105 : f32 to vector<8x64xf32>
    %243 = arith.mulf %241, %242 : vector<8x64xf32>
    %cst_106 = arith.constant 9.99999974E-6 : f32
    %244 = vector.broadcast %cst_106 : f32 to vector<8x64xf32>
    %245 = arith.addf %243, %244 : vector<8x64xf32>
    %246 = math.rsqrt %245 : vector<8x64xf32>
    %247 = arith.mulf %221, %246 : vector<8x64xf32>
    %248 = vector.broadcast %196 : vector<1x64xf32> to vector<8x64xf32>
    %249 = arith.mulf %247, %248 : vector<8x64xf32>
    %250 = vector.broadcast %197 : vector<1x64xf32> to vector<8x64xf32>
    %251 = arith.addf %249, %250 : vector<8x64xf32>
    %cst_107 = arith.constant 0.000000e+00 : f32
    %252 = vector.broadcast %cst_107 : f32 to vector<8x64xf32>
    %253 = arith.cmpf ogt, %251, %252 : vector<8x64xf32>
    %cst_108 = arith.constant 0.000000e+00 : f32
    %254 = vector.broadcast %cst_108 : f32 to vector<8x64xf32>
    %255 = arith.minimumf %251, %254 : vector<8x64xf32>
    %256 = math.exp %255 : vector<8x64xf32>
    %cst_109 = arith.constant 1.000000e+00 : f32
    %257 = vector.broadcast %cst_109 : f32 to vector<8x64xf32>
    %258 = arith.subf %256, %257 : vector<8x64xf32>
    %259 = arith.select %253, %251, %258 : vector<8x64xi1>, vector<8x64xf32>
    %c0_110 = arith.constant 0 : index
    %c0_111 = arith.constant 0 : index
    %260 = vector.load %arg10[%c0_110, %c0_111] : memref<64x256xf32, #tpu.memory_space<vmem>>, vector<64x256xf32>
    %cst_112 = arith.constant dense<0.000000e+00> : vector<8x256xf32>
    %261 = tpu.matmul %259, %260, %cst_112 {dimension_numbers = #tpu.dot_dimension_numbers<[1], [0], [0], [1], [0, 0, 1, 1], [], []>} : vector<8x64xf32>, vector<64x256xf32>, vector<8x256xf32> -> vector<8x256xf32>
    %262 = tpu.iota {dimensions = array<i32: 1>} : vector<1x256xi32>
    %c255_i32 = arith.constant 255 : i32
    %263 = vector.broadcast %c255_i32 : i32 to vector<1x256xi32>
    %264 = arith.cmpi slt, %262, %263 : vector<1x256xi32>
    %cst_113 = arith.constant 0xFF800000 : f32
    %265 = vector.shape_cast %264 : vector<1x256xi1> to vector<1x256xi1>
    %266 = vector.broadcast %265 : vector<1x256xi1> to vector<8x256xi1>
    %267 = vector.broadcast %cst_113 : f32 to vector<8x256xf32>
    %268 = arith.select %266, %261, %267 : vector<8x256xi1>, vector<8x256xf32>
    %cst_114 = arith.constant dense<0xFF800000> : vector<8xf32>
    %269 = vector.multi_reduction <maximumf>, %268, %cst_114 [1] : vector<8x256xf32> to vector<8xf32>
    %270 = vector.shape_cast %269 : vector<8xf32> to vector<8x1xf32>
    %271 = vector.broadcast %270 : vector<8x1xf32> to vector<8x256xf32>
    %272 = arith.subf %268, %271 : vector<8x256xf32>
    %273 = math.exp %272 : vector<8x256xf32>
    %cst_115 = arith.constant dense<0.000000e+00> : vector<8xf32>
    %274 = vector.multi_reduction <add>, %273, %cst_115 [1] : vector<8x256xf32> to vector<8xf32>
    %275 = vector.shape_cast %274 : vector<8xf32> to vector<8x1xf32>
    %c0_116 = arith.constant 0 : index
    %c0_117 = arith.constant 0 : index
    %276 = vector.load %arg16[%c0_116, %c0_117] : memref<1x256xf32, #tpu.memory_space<vmem>>, vector<1x256xf32>
    %277 = vector.broadcast %276 : vector<1x256xf32> to vector<8x256xf32>
    %278 = arith.mulf %273, %277 : vector<8x256xf32>
    %cst_118 = arith.constant dense<0.000000e+00> : vector<8xf32>
    %279 = vector.multi_reduction <add>, %278, %cst_118 [1] : vector<8x256xf32> to vector<8xf32>
    %280 = vector.shape_cast %279 : vector<8xf32> to vector<8x1xf32>
    %281 = arith.divf %280, %275 : vector<8x1xf32>
    %c255_i32_119 = arith.constant 255 : i32
    %282 = vector.broadcast %c255_i32_119 : i32 to vector<1x256xi32>
    %283 = arith.cmpi eq, %262, %282 : vector<1x256xi32>
    %cst_120 = arith.constant 0.000000e+00 : f32
    %284 = vector.shape_cast %283 : vector<1x256xi1> to vector<1x256xi1>
    %285 = vector.broadcast %284 : vector<1x256xi1> to vector<8x256xi1>
    %286 = vector.broadcast %cst_120 : f32 to vector<8x256xf32>
    %287 = arith.select %285, %261, %286 : vector<8x256xi1>, vector<8x256xf32>
    %cst_121 = arith.constant dense<0.000000e+00> : vector<8xf32>
    %288 = vector.multi_reduction <add>, %287, %cst_121 [1] : vector<8x256xf32> to vector<8xf32>
    %289 = vector.shape_cast %288 : vector<8xf32> to vector<8x1xf32>
    %290 = tpu.iota {dimensions = array<i32: 1>} : vector<1x2xi32>
    %c0_i32 = arith.constant 0 : i32
    %291 = vector.broadcast %c0_i32 : i32 to vector<1x2xi32>
    %292 = arith.cmpi eq, %290, %291 : vector<1x2xi32>
    %293 = vector.shape_cast %292 : vector<1x2xi1> to vector<1x2xi1>
    %294 = vector.broadcast %293 : vector<1x2xi1> to vector<8x2xi1>
    %295 = vector.shape_cast %281 : vector<8x1xf32> to vector<8x1xf32>
    %296 = vector.broadcast %295 : vector<8x1xf32> to vector<8x2xf32>
    %297 = vector.shape_cast %289 : vector<8x1xf32> to vector<8x1xf32>
    %298 = vector.broadcast %297 : vector<8x1xf32> to vector<8x2xf32>
    %299 = arith.select %294, %296, %298 : vector<8x2xi1>, vector<8x2xf32>
    %c0_122 = arith.constant 0 : index
    %c0_123 = arith.constant 0 : index
    %300 = vector.load %arg17[%c0_122, %c0_123] : memref<8x2xf32, #tpu.memory_space<vmem>>, vector<8x2xf32>
    tpu.vector_store %arg17[%c0_122, %c0_123], %299 {strides = array<i32>} : memref<8x2xf32, #tpu.memory_space<vmem>>, vector<8x2xf32>,
    return
  }
  func.func @transform_0(%arg0: i32) -> (i32, i32) {
    %c0_i32 = arith.constant 0 : i32
    %c0_i32_0 = arith.constant 0 : i32
    return %arg0, %c0_i32 : i32, i32
  }
  func.func @transform_1(%arg0: i32) -> (i32, i32) {
    %c0_i32 = arith.constant 0 : i32
    %c0_i32_0 = arith.constant 0 : i32
    return %arg0, %c0_i32 : i32, i32
  }
  func.func @transform_2(%arg0: i32) -> (i32, i32) {
    %c0_i32 = arith.constant 0 : i32
    %c0_i32_0 = arith.constant 0 : i32
    %c0_i32_1 = arith.constant 0 : i32
    return %c0_i32, %c0_i32_0 : i32, i32
  }
  func.func @transform_3(%arg0: i32) -> (i32, i32) {
    %c0_i32 = arith.constant 0 : i32
    %c0_i32_0 = arith.constant 0 : i32
    %c0_i32_1 = arith.constant 0 : i32
    return %c0_i32, %c0_i32_0 : i32, i32
  }
  func.func @transform_4(%arg0: i32) -> (i32, i32) {
    %c0_i32 = arith.constant 0 : i32
    %c0_i32_0 = arith.constant 0 : i32
    %c0_i32_1 = arith.constant 0 : i32
    return %c0_i32, %c0_i32_0 : i32, i32
  }
  func.func @transform_5(%arg0: i32) -> (i32, i32) {
    %c0_i32 = arith.constant 0 : i32
    %c0_i32_0 = arith.constant 0 : i32
    %c0_i32_1 = arith.constant 0 : i32
    return %c0_i32, %c0_i32_0 : i32, i32
  }
  func.func @transform_6(%arg0: i32) -> (i32, i32) {
    %c0_i32 = arith.constant 0 : i32
    %c0_i32_0 = arith.constant 0 : i32
    %c0_i32_1 = arith.constant 0 : i32
    return %c0_i32, %c0_i32_0 : i32, i32
  }
  func.func @transform_7(%arg0: i32) -> (i32, i32) {
    %c0_i32 = arith.constant 0 : i32
    %c0_i32_0 = arith.constant 0 : i32
    %c0_i32_1 = arith.constant 0 : i32
    return %c0_i32, %c0_i32_0 : i32, i32
  }
  func.func @transform_8(%arg0: i32) -> (i32, i32) {
    %c0_i32 = arith.constant 0 : i32
    %c0_i32_0 = arith.constant 0 : i32
    %c0_i32_1 = arith.constant 0 : i32
    return %c0_i32, %c0_i32_0 : i32, i32
  }
  func.func @transform_9(%arg0: i32) -> (i32, i32) {
    %c0_i32 = arith.constant 0 : i32
    %c0_i32_0 = arith.constant 0 : i32
    %c0_i32_1 = arith.constant 0 : i32
    return %c0_i32, %c0_i32_0 : i32, i32
  }
  func.func @transform_10(%arg0: i32) -> (i32, i32) {
    %c0_i32 = arith.constant 0 : i32
    %c0_i32_0 = arith.constant 0 : i32
    %c0_i32_1 = arith.constant 0 : i32
    return %c0_i32, %c0_i32_0 : i32, i32
  }
  func.func @transform_11(%arg0: i32) -> (i32, i32) {
    %c0_i32 = arith.constant 0 : i32
    %c0_i32_0 = arith.constant 0 : i32
    %c0_i32_1 = arith.constant 0 : i32
    return %c0_i32, %c0_i32_0 : i32, i32
  }
  func.func @transform_12(%arg0: i32) -> (i32, i32) {
    %c0_i32 = arith.constant 0 : i32
    %c0_i32_0 = arith.constant 0 : i32
    %c0_i32_1 = arith.constant 0 : i32
    return %c0_i32, %c0_i32_0 : i32, i32
  }
  func.func @transform_13(%arg0: i32) -> (i32, i32) {
    %c0_i32 = arith.constant 0 : i32
    %c0_i32_0 = arith.constant 0 : i32
    %c0_i32_1 = arith.constant 0 : i32
    return %c0_i32, %c0_i32_0 : i32, i32
  }
  func.func @transform_14(%arg0: i32) -> (i32, i32) {
    %c0_i32 = arith.constant 0 : i32
    %c0_i32_0 = arith.constant 0 : i32
    %c0_i32_1 = arith.constant 0 : i32
    return %c0_i32, %c0_i32_0 : i32, i32
  }
  func.func @transform_15(%arg0: i32) -> (i32, i32) {
    %c0_i32 = arith.constant 0 : i32
    %c0_i32_0 = arith.constant 0 : i32
    %c0_i32_1 = arith.constant 0 : i32
    return %c0_i32, %c0_i32_0 : i32, i32
  }
  func.func @transform_16(%arg0: i32) -> (i32, i32) {
    %c0_i32 = arith.constant 0 : i32
    %c0_i32_0 = arith.constant 0 : i32
    return %arg0, %c0_i32 : i32, i32
  }
}

</mosaic_0001>

<bundles_post_ra>
// kernel: tpu_custom_call.1
= control target key start
LH: loop header
LB: loop body
LE: loop exit
PB: predicated region body
PF: predicated region fallthrough
CT: control target
= control target key end

     0   :  { %s2799_s0 = inlined_call_operand.hbm [shape: f32[16,32], index: 0, kind: input, shape index: {}]   ;;  %s2800_s1 = inlined_call_operand.vmem [shape: f32[16,8], index: 1, kind: input, shape index: {}]   ;;  %s2801_s2 = inlined_call_operand.hbm [shape: f32[32,32], index: 2, kind: input, shape index: {}]   ;;  %s2802_s3 = inlined_call_operand.hbm [shape: f32[32,32], index: 3, kind: input, shape index: {}]   ;;  %s2803_s4 = inlined_call_operand.hbm [shape: f32[8,16], index: 4, kind: input, shape index: {}]   ;;  %s2804_s5 = inlined_call_operand.vmem [shape: f32[32,32], index: 5, kind: input, shape index: {}]   ;;  %s2805_s6 = inlined_call_operand.hbm [shape: f32[16,32], index: 6, kind: input, shape index: {}]   ;;  %s2806_s7 = inlined_call_operand.hbm [shape: f32[32,32], index: 7, kind: input, shape index: {}]   ;;  %s2807_s8 = inlined_call_operand.hbm [shape: f32[32,64], index: 8, kind: input, shape index: {}]   ;;  %s2808_s9 = inlined_call_operand.hbm [shape: f32[64,256], index: 9, kind: input, shape index: {}]   ;;  %s2809_s10 = inlined_call_operand.vmem [shape: f32[4,32], index: 10, kind: input, shape index: {}]   ;;  %s2810_s11 = inlined_call_operand.vmem [shape: f32[4,32], index: 11, kind: input, shape index: {}]   ;;  %s2811_s12 = inlined_call_operand.vmem [shape: f32[4,32], index: 12, kind: input, shape index: {}]   ;;  %s2812_s13 = inlined_call_operand.hbm [shape: f32[3,16], index: 13, kind: input, shape index: {}]   ;;  %s2813_s14 = inlined_call_operand.vmem [shape: f32[3,64], index: 14, kind: input, shape index: {}]   ;;  %s2814_s15 = inlined_call_operand.vmem [shape: f32[1,256], index: 15, kind: input, shape index: {}]   ;;  %s2815_s16 = inlined_call_operand.vmem [shape: f32[16,2], index: 16, kind: output, shape index: {}]  }
   0x1   :  { %2825 = sst [smem:[#allocation21_spill]] %s2799_s0 }
   0x2   :  { %2826 = sst [smem:[#allocation22_spill]] %s2801_s2 }
   0x3   :  { %2827 = sst [smem:[#allocation23_spill]] %s2802_s3 }
   0x4   :  { %2828 = sst [smem:[#allocation24_spill]] %s2803_s4 }
   0x5   :  { %2829 = sst [smem:[#allocation25_spill]] %s2805_s6 }
   0x6   :  { %2830 = sst [smem:[#allocation26_spill]] %s2813_s14 }
   0x7   :  { %2831 = sst [smem:[#allocation27_spill]] %s2814_s15 }
   0x8   :  { %2832 = sst [smem:[#allocation28_spill]] %s2815_s16 }
   0x9   :  { %21 = vsyncpa [#allocation3], 0 }
   0xa   :  { %23 = vsyncpa [#allocation3 + $0x1], 0 }
   0xb   :  { %24 = vsyncpa [#allocation5], 0 }
   0xc   :  { %25 = vsyncpa [#allocation8], 0 }
   0xd   :  { %26 = vsyncpa [#allocation11], 0 }
   0xe   :  { %27 = vsyncpa [#allocation14], 0  ;;  %s2442_s21 = smov 0   ;;  %s2444_s22 = smov 0  }
   0xf   :  { %s2446_s23 = smov 0   ;;  %s2448_s24 = smov 0  }
  0x10 LB: > { %s2342_s25 = smov [#allocation4]   ;;  %s2463_s27 = sadd.s32 4294967295, %s2340_s24   ;;  %s2340_s24 = sphi %s2448_s24, %s2861_s24   ;;  %s2336_s23 = sphi %s2446_s23, %s2860_s23   ;;  %s2332_s22 = sphi %s2444_s22, %s2859_s22   ;;  %s2328_s21 = sphi %s2442_s21, %s2858_s21  }
  0x11   : > { %s422_s26 = sshll.u32 %s2342_s25, 4  ;;  %p1743_p0 = scmp.ge.s32.totalorder %s2340_s24, 1  ;;  %s423_s26 = int_to_ptr.vmem [resolvable:$true] %s422_s26 }
  0x12   : > { %p2822_p1 = scmp.eq.s32.totalorder %s2463_s27, 0  ;;  %p410_p2 = scmp.lt.s32.totalorder %s2340_s24, 3 }
  0x13   : > { %s2343_s29 = smov [#allocation7]   ;;  %s2344_s17 = smov [#allocation10]  }
  0x14   : > { %p2468_p3 = pnand %p1743_p0, %p410_p2  ;;  %s449_s30 = sshll.u32 %s2343_s29, 4  ;;  %s450_s30 = int_to_ptr.vmem [resolvable:$true] %s449_s30 }
  0x15   : > { %s475_s18 = sshll.u32 %s2344_s17, 4  ;;  %s2065_s20 = scalar_lea.vmem %s423_s26, 512  ;;  %s2480_s18 = int_to_ptr.vmem [resolvable:$true] %s475_s18 }
  0x16   : > { %s2833_s28 = scalar_select %p2468_p3, 1, 0 }
  0x17   : > { %p1932_p4 = pneg %p2468_p3  ;;  %p2066_p7 = scmp.ne.s32.totalorder %s423_s26, %s2065_s20 }
  0x18   : > { %p2073_p10 = scmp.lt.s32.totalorder %s423_s26, %s423_s26  ;;  %p2074_p11 = scmp.lt.s32.totalorder %s2065_s20, %s2065_s20 }
  0x19   : > { %p2476_p5 = pnand %p1932_p4, %p2822_p1 }
  0x1a   : > { %p2075_p12 = por %p2074_p11, %p2073_p10 }
  0x1b   : > { %p2484_p6 = pneg %p2476_p5 }
  0x1d   : > { %p2068_p8 = pnand %p2066_p7, %p2484_p6 }
  0x1f   : > { %p2069_p9 = pneg %p2068_p8 }
  0x21   : > { %p2076_p13 = pnand %p2075_p12, %p2069_p9 }
  0x23   : > { %2079 = shalt.err (!%p2076_p13)
}
  0x24   : > { %s2818_s25 = smov 128   ;;  %s2820_s29 = smov 8  }
  0x25   : > { %s2836_s2 = sld [smem:[#allocation22_spill]]  ;;  %s2091_s15 = scalar_lea.vmem %s450_s30, 128 }
  0x26   : > { %p2092_p0 = scmp.ne.s32.totalorder %s450_s30, %s2091_s15  ;;  %p2099_p7 = scmp.lt.s32.totalorder %s450_s30, %s450_s30 }
  0x27   : > { %p2100_p8 = scmp.lt.s32.totalorder %s2091_s15, %s2091_s15 }
  0x28   : > { %p2094_p2 = pnand %p2092_p0, %p2484_p6 }
  0x29   : > { %p2101_p9 = por %p2100_p8, %p2099_p7 }
  0x2a   : > { %p2095_p4 = pneg %p2094_p2 }
  0x2b   : > { %1935 = dma.hbm_to_vmem [thread:$0]  (!%p2476_p5), %s2836_s2, 512, %s423_s26, [#allocation5], %s2818_s25, %s2818_s25, %s2820_s29  }
  0x2c   : > { %p2102_p10 = pnand %p2101_p9, %p2095_p4 }
  0x2e   : > { %2105 = shalt.err (!%p2102_p10)
}
  0x2f   : > { %s2837_s4 = sld [smem:[#allocation24_spill]]  ;;  %s2117_s16 = scalar_lea.vmem %s2480_s18, 512 }
  0x30   : > { %p2118_p11 = scmp.ne.s32.totalorder %s2480_s18, %s2117_s16  ;;  %p2125_p0 = scmp.lt.s32.totalorder %s2480_s18, %s2480_s18 }
  0x31   : > { %p2126_p2 = scmp.lt.s32.totalorder %s2117_s16, %s2117_s16 }
  0x32   : > { %p2120_p12 = pnand %p2118_p11, %p2484_p6 }
  0x33   : > { %p2127_p4 = por %p2126_p2, %p2125_p0 }
  0x34   : > { %p2121_p13 = pneg %p2120_p12 }
  0x35   : > { %1941 = dma.hbm_to_vmem [thread:$0]  (!%p2476_p5), %s2837_s4, 128, %s450_s30, [#allocation8]  }
  0x36   : > { %p2128_p7 = pnand %p2127_p4, %p2121_p13 }
  0x38   : > { %2131 = shalt.err (!%p2128_p7)
}
  0x39   : > { %1947 = dma.hbm_to_vmem [thread:$0]  (!%p2476_p5), %s2806_s7, 512, %s2480_s18, [#allocation11], %s2818_s25, %s2818_s25, %s2820_s29  }
  0x3a   : > { %s2347_s26 = smov [#allocation13]  }
  0x3b   : > { %s501_s30 = sshll.u32 %s2347_s26, 4  ;;  %s502_s30 = int_to_ptr.vmem [resolvable:$true] %s501_s30 }
  0x3c   : > { %s2143_s17 = scalar_lea.vmem %s502_s30, 2048  ;;  %p2151_p11 = scmp.lt.s32.totalorder %s502_s30, %s502_s30 }
  0x3d   : > { %p2144_p8 = scmp.ne.s32.totalorder %s502_s30, %s2143_s17  ;;  %p2152_p12 = scmp.lt.s32.totalorder %s2143_s17, %s2143_s17 }
  0x3f   : > { %p2146_p9 = pnand %p2144_p8, %p2484_p6  ;;  %p2153_p13 = por %p2152_p12, %p2151_p11 }
  0x41   : > { %p2147_p10 = pneg %p2146_p9 }
  0x43   : > { %p2154_p0 = pnand %p2153_p13, %p2147_p10 }
  0x45   : > { %2157 = shalt.err (!%p2154_p0)
}
  0x46   : > { %s2348_s20 = smov 256   ;;  %s2349_s16 = smov 16  }
  0x47   : > { %1953 = dma.hbm_to_vmem [thread:$0]  (!%p2476_p5), %s2808_s9, 2048, %s502_s30, [#allocation14], %s2348_s20, %s2348_s20, %s2349_s16  }
  0x48   : > { %s2350_s15 = smov [#allocation6]   ;;  %s2351_s25 = smov [#allocation9]  }
  0x49   : > { %s435_s26 = sshll.u32 %s2350_s15, 4  ;;  %s462_s29 = sshll.u32 %s2351_s25, 4  ;;  %s436_s26 = int_to_ptr.vmem [resolvable:$true] %s435_s26  ;;  %s463_s29 = int_to_ptr.vmem [resolvable:$true] %s462_s29 }
  0x4a   : > { %s2169_s2 = scalar_lea.vmem %s436_s26, 512  ;;  %p2177_p8 = scmp.lt.s32.totalorder %s436_s26, %s436_s26 }
  0x4b   : > { %p2170_p2 = scmp.ne.s32.totalorder %s436_s26, %s2169_s2  ;;  %p2178_p9 = scmp.lt.s32.totalorder %s2169_s2, %s2169_s2 }
  0x4d   : > { %p2172_p4 = pnand %p2170_p2, %p2484_p6  ;;  %p2179_p10 = por %p2178_p9, %p2177_p8 }
  0x4f   : > { %p2173_p7 = pneg %p2172_p4 }
  0x51   : > { %p2180_p11 = pnand %p2179_p10, %p2173_p7 }
  0x53   : > { %2183 = shalt.err (!%p2180_p11)
}
  0x54   : > { %s2838_s17 = smov 8   ;;  %s2839_s30 = smov 128  }
  0x55   : > { %s2840_s3 = sld [smem:[#allocation23_spill]]  ;;  %s2195_s25 = scalar_lea.vmem %s463_s29, 256 }
  0x56   : > { %p2196_p12 = scmp.ne.s32.totalorder %s463_s29, %s2195_s25  ;;  %p2203_p2 = scmp.lt.s32.totalorder %s463_s29, %s463_s29 }
  0x57   : > { %p2204_p4 = scmp.lt.s32.totalorder %s2195_s25, %s2195_s25 }
  0x58   : > { %p2198_p13 = pnand %p2196_p12, %p2484_p6 }
  0x59   : > { %p2205_p8 = por %p2204_p4, %p2203_p2 }
  0x5a   : > { %p2199_p0 = pneg %p2198_p13 }
  0x5b   : > { %1938 = dma.hbm_to_vmem [thread:$0]  (!%p2476_p5), %s2840_s3, 512, %s436_s26, [#allocation5], %s2839_s30, %s2839_s30, %s2838_s17  }
  0x5c   : > { %p2206_p7 = pnand %p2205_p8, %p2199_p0 }
  0x5e   : > { %2209 = shalt.err (!%p2206_p7)
}
  0x5f   : > { %s2841_s6 = sld [smem:[#allocation25_spill]]  ;;  %s2352_s18 = smov [#allocation12]  }
  0x60   : > { %s488_s15 = sshll.u32 %s2352_s18, 4  ;;  %s2353_s26 = smov [#allocation15]   ;;  %s489_s15 = int_to_ptr.vmem [resolvable:$true] %s488_s15 }
  0x61   : > { %s524_s20 = sshll.u32 %s2353_s26, 4  ;;  %s2221_s16 = scalar_lea.vmem %s489_s15, 512  ;;  %s525_s20 = int_to_ptr.vmem [resolvable:$true] %s524_s20 }
  0x62   : > { %p2222_p9 = scmp.ne.s32.totalorder %s489_s15, %s2221_s16  ;;  %p2229_p12 = scmp.lt.s32.totalorder %s489_s15, %s489_s15 }
  0x63   : > { %p2230_p13 = scmp.lt.s32.totalorder %s2221_s16, %s2221_s16 }
  0x64   : > { %p2224_p10 = pnand %p2222_p9, %p2484_p6 }
  0x65   : > { %1944 = dma.hbm_to_vmem [thread:$0]  (!%p2476_p5), %s2841_s6, 256, %s463_s29, [#allocation8], %s2839_s30, %s2839_s30, %s2838_s17  }
  0x66   : > { %p2225_p11 = pneg %p2224_p10  ;;  %p2231_p0 = por %p2230_p13, %p2229_p12 }
  0x68   : > { %p2232_p2 = pnand %p2231_p0, %p2225_p11 }
  0x6a   : > { %2235 = shalt.err (!%p2232_p2)
}
  0x6b   : > { %1950 = dma.hbm_to_vmem [thread:$0]  (!%p2476_p5), %s2807_s8, 512, %s489_s15, [#allocation11], %s2839_s30, %s2839_s30, %s2838_s17  }
  0x6c   : > { %s2247_s2 = scalar_lea.vmem %s525_s20, 64  ;;  %p2255_p9 = scmp.lt.s32.totalorder %s525_s20, %s525_s20 }
  0x6d   : > { %p2248_p4 = scmp.ne.s32.totalorder %s525_s20, %s2247_s2  ;;  %p2256_p10 = scmp.lt.s32.totalorder %s2247_s2, %s2247_s2 }
  0x6f   : > { %p2250_p8 = pnand %p2248_p4, %p2484_p6  ;;  %p2257_p12 = por %p2256_p10, %p2255_p9 }
  0x71   : > { %p2251_p7 = pneg %p2250_p8 }
  0x73   : > { %p2258_p11 = pnand %p2257_p12, %p2251_p7 }
  0x75   : > { %2261 = shalt.err (!%p2258_p11)
}
  0x76   : > { %1956 = dma.hbm_to_vmem [thread:$0]  (!%p2476_p5), %s2812_s13, 64, %s525_s20, [#allocation14]  }
  0x77   : > { %s2565_s19 = sadd.s32 1, %s2340_s24   ;;  %s40_s0 = sadd.s32 1, %s2336_s23 }
  0x78   : > { %s37_s17 = ssub.s32 %s2340_s24, %s2565_s19  ;;  %p47_p6 = scmp.ne.s32.totalorder %s2336_s23, %s2332_s22 }
  0x79   : > { %p38_p13 = scmp.eq.s32.totalorder %s37_s17, 0  ;;  %p48_p0 = scmp.eq.s32.totalorder %s2340_s24, 0 }
  0x7a   : > { %p53_p2 = scmp.ne.s32.totalorder %s2332_s22, %s2328_s21  ;;  %p1969_p4 = scmp.lt.s32.totalorder %s2340_s24, 2 }
  0x7b   : > { %s2577_s30 = scalar_select %p38_p13, %s2336_s23, %s40_s0  }
  0x7c   : > { %p49_p8 = por %p48_p0, %p47_p6  ;;  %p2581_p7 = por %p2822_p1, %p53_p2 }
  0x7d   : > { %s541_s26 = sand.u32 1, %s2336_s23   ;;  %s1754_s20 = sshll.u32 %s2340_s24, 7 }
  0x7e   : > { %s2842_s15 = scalar_select %p2581_p7, 1, 0 }
  0x7f   : > { %s1753_s16 = sshll.u32 %s541_s26, 3  ;;  %s2843_s2 = sld [smem:[#allocation21_spill]] }
  0x80   : > { %s545_s21 = scalar_lea.vmem [#allocation2], %s1753_s16  ;;  %p2592_p5 = pnand %p1969_p4, %p49_p8 }
  0x81   : > { %s552_s18 = sshll.u32 %s545_s21, 4  ;;  %s542_s17 = scalar_lea.sflag [#allocation3], %s541_s26  ;;  %s553_s18 = int_to_ptr.vmem [resolvable:$true] %s552_s18 }
  0x82   : > { %p2264_p10 = pneg %p2592_p5 }
  0x85   : > { %s2590_s14 = scalar_lea.hbm %s2843_s2, %s1754_s20  ;;  %s2267_s29 = scalar_lea.hbm %s2843_s2, 256 }
  0x86   : > { %s2262_s3 = scalar_lea.hbm %s2590_s14, 128  ;;  %p2268_p6 = scmp.lt.s32.totalorder %s2590_s14, %s2843_s2 }
  0x87   : > { %p2263_p9 = scmp.ne.s32.totalorder %s2590_s14, %s2262_s3  ;;  %p2269_p13 = scmp.lt.s32.totalorder %s2267_s29, %s2262_s3 }
  0x89   : > { %p2265_p12 = pnand %p2264_p10, %p2263_p9  ;;  %p2270_p0 = por %p2269_p13, %p2268_p6 }
  0x8b   : > { %p2266_p11 = pneg %p2265_p12 }
  0x8d   : > { %p2271_p2 = pnand %p2270_p0, %p2266_p11 }
  0x8f   : > { %2274 = shalt.err (!%p2271_p2)
}
  0x90   : > { %s2275_s21 = scalar_lea.vmem %s553_s18, 128  ;;  %s2354_s26 = smov [#allocation2]  }
  0x91   : > { %p2276_p4 = scmp.ne.s32.totalorder %s553_s18, %s2275_s21  ;;  %s2280_s4 = sshll.u32 %s2354_s26, 4  ;;  %s2281_s4 = int_to_ptr.vmem [resolvable:$false] %s2280_s4 }
  0x92   : > { %s2282_s6 = scalar_lea.vmem %s2281_s4, 256  ;;  %p2283_p9 = scmp.lt.s32.totalorder %s553_s18, %s2281_s4 }
  0x93   : > { %p2278_p8 = pnand %p2276_p4, %p2264_p10  ;;  %p2284_p12 = scmp.lt.s32.totalorder %s2282_s6, %s2275_s21 }
  0x95   : > { %p2279_p1 = pneg %p2278_p8  ;;  %p2285_p7 = por %p2284_p12, %p2283_p9 }
  0x97   : > { %p2286_p3 = pnand %p2285_p7, %p2279_p1 }
  0x99   : > { %2289 = shalt.err (!%p2286_p3)
}
  0x9a   : > { %1960 = dma.hbm_to_vmem [thread:$0]  (!%p2592_p5), %s2590_s14, 128, %s553_s18, %s542_s17  }
  0x9b   : > { %p2845_p11 = scmp.ne.s32.totalorder %s2833_s28, 0 }
  0x9c   : > { %s570_s3 = sand.u32 (!%p2845_p11), 1, %s2332_s22   ;;  %p2846_p10 = scmp.ne.s32.totalorder (!%p2845_p11), %s2842_s15, 0 }
  0x9d   : > { %568 = sbr.rel (%p2845_p11) target bundleno = 3324 (0xcfc), region = 84  ;;  %s1756_s24 = sshll.u32 (!%p2845_p11), %s570_s3, 3 }
  0x9e   : > { %s571_s20 = scalar_lea.sflag (!%p2845_p11), [#allocation3], %s570_s3  ;;  %s574_s29 = scalar_lea.vmem (!%p2845_p11), [#allocation2], %s1756_s24 }
  0xa2   : > { %2307 = dma.done.wait (%p2846_p10), %s571_s20, 128  }
  0xa3   : > { %2309 = vsyncadd (%p2846_p10), %s571_s20, 4294967168  ;;  %p2847_p1 = scmp.eq.s32.totalorder %s2463_s27, 0 }
  0xa5   : > { %2311 = dma.done.wait (%p2847_p1), [#allocation5], 1024   ;;  %p2848_p3 = pmov %p2847_p1 }
  0xa6   : > { %p2849_p7 = pmov %p2847_p1 }
  0xa7   : > { %2313 = vsyncadd (%p2848_p3), [#allocation5], 4294966272 }
  0xa8   : > { %2315 = dma.done.wait (%p2849_p7), [#allocation8], 384   ;;  %p2850_p5 = pmov %p2847_p1 }
  0xa9   : > { %p2851_p6 = pmov %p2847_p1 }
  0xaa   : > { %2317 = vsyncadd (%p2850_p5), [#allocation8], 4294966912 }
  0xab   : > { %2319 = dma.done.wait (%p2851_p6), [#allocation11], 1024   ;;  %p2852_p13 = pmov %p2847_p1 }
  0xac   : > { %p2853_p0 = pmov %p2847_p1 }
  0xad   : > { %2321 = vsyncadd (%p2852_p13), [#allocation11], 4294966272 }
  0xae   : > { %2323 = dma.done.wait (%p2853_p0), [#allocation14], 2112   ;;  %p2854_p2 = pmov %p2853_p0 }
  0xaf   : > { %v2355_v0 = vmov 0.0   ;;  %vm2356_vm0 = vmmov 0   ;;  %v671_v1 = vld [vmem:[#allocation4 + $0x18] sm:$0xff]  ;;  %v670_v2 = vld [vmem:[#allocation4 + $0x10] sm:$0xff]  ;;  %v669_v3 = vld [vmem:[#allocation4 + $0x8] sm:$0xff]  ;;  %vm677_vm1 = vcmask 261120  }
  0xb0   : > { %2325 = vsyncadd (%p2854_p2), [#allocation14], 4294965184  ;;  %1831 = vmatprep.subr.mxu0 %v2355_v0  ;;  %1839 = vmatprep.mubr.msk.f32.mxu0 %vm2356_vm0, %v2355_v0  ;;  %v668_v4 = vld [vmem:[#allocation4] sm:$0xff]  ;;  %v666_v5 = vld [vmem:[%s574_s29] sm:$0xff]  ;;  %p658_p4 = scmp.lt.s32.totalorder %s2463_s27, 1  ;;  %vm902_vm2 = vcmask 64512  }
  0xb1   : > { %1842 = vmatprep.subr.mxu1 %v2355_v0  ;;  %1850 = vmatprep.mubr.msk.f32.mxu1 %vm2356_vm0, %v2355_v0  ;;  %v896_v6 = vld [vmem:[#allocation7] sm:$0xff]  ;;  %v1767_v8 = vld [vmem:[%s2809_s10] ss:$0 sm:$0xff]  ;;  %v1777_v13 = vld [vmem:[#allocation15] ss:$0 sm:$0xff]  ;;  %vm978_vm3 = vcmask 130048  }
  0xb2   : > { %1832 = vmatpush3.msra.mxu0 %v671_v1  ;;  %s2863_s27 = smov (!%p658_p4, %s2463_s27), 1  ;;  %v786_v23 = vld [vmem:[#allocation6 + $0x18] sm:$0xff]  ;;  %v785_v24 = vld [vmem:[#allocation6 + $0x10] sm:$0xff]  ;;  %v784_v25 = vld [vmem:[#allocation6 + $0x8] sm:$0xff]  ;;  %s2855_s25 = sld [smem:[#allocation26_spill]]  ;;  %vm1401_vm10 = vcmask 523264  }
  0xb3   : > { %1833 = vmatprep.subr.mxu0 %v2355_v0  ;;  %s1765_s4 = sshll.u32 %s2863_s27, 3  ;;  %1843 = vmatpush3.msra.mxu1 %v786_v23  ;;  %v783_v26 = vld [vmem:[#allocation6] sm:$0xff]  ;;  %v1769_v36 = vld [vmem:[%s2810_s11] ss:$0 sm:$0xff]  ;;  %v1779_v51 = vld [vmem:[#allocation15 + $0x1] ss:$0 sm:$0xff] }
  0xb4   : > { %1834 = vmatpush3.msra.mxu0 %v670_v2  ;;  %s661_s15 = scalar_lea.vmem %s2800_s1, %s1765_s4  ;;  %1844 = vmatprep.subr.mxu1 %v2355_v0  ;;  %v1770_v38 = vld [vmem:[%s2811_s12] ss:$0 sm:$0xff]  ;;  %v1780_v53 = vld [vmem:[#allocation15 + $0x2] ss:$0 sm:$0xff]  ;;  %v1013_v60 = vld [vmem:[#allocation9] sm:$0xff]  ;;  %s2856_s29 = sld [smem:[#allocation27_spill]] }
  0xb5   : > { %1835 = vmatprep.subr.mxu0 %v2355_v0  ;;  %v667_v7 = vld [vmem:[%s661_s15] sm:$0xff]  ;;  %1845 = vmatpush3.msra.mxu1 %v785_v24  ;;  %s2857_s15 = sld [smem:[#allocation28_spill]]  ;;  %vm1587_vm15 = vcmask 15360  }
  0xb6   : > { %1836 = vmatpush3.msra.mxu0 %v669_v3  ;;  %1846 = vmatprep.subr.mxu1 %v2355_v0  ;;  %v1014_v58 = vld [vmem:[#allocation9 + $0x8] sm:$0xff] }
  0xb7   : > { %1837 = vmatprep.subr.mxu0 %v2355_v0  ;;  %1847 = vmatpush3.msra.mxu1 %v784_v25  ;;  %v1772_v62 = vld [vmem:[%s2809_s10 + $0x1] ss:$0 sm:$0xff] }
  0xb8   : > { %1838 = vmatpush3.msra.mxu0 %v668_v4  ;;  %1848 = vmatprep.subr.mxu1 %v2355_v0 }
  0xb9   : > { %1840 = vmatmul.mubr.msk.f32.vlgmr.msra.gmra.mxu0 %vm677_vm1, %v666_v5  ;;  %1853 = vmatprep.subr.mxu0 %v2355_v0 }
  0xba   : > { %1855 = vmatprep.mubr.msk.f32.mxu0 %vm2356_vm0, %v2355_v0  ;;  %1854 = vmatpush3.msra.mxu0 %v896_v6 }
  0xbb   : > { %1858 = vmatprep.subr.mxu0 %v2355_v0  ;;  %1849 = vmatpush3.msra.mxu1 %v783_v26  ;;  %s665_s14 = scalar_lea.vmem %s2857_s15, %s1765_s4 }
  0xbc   : > { %1876 = vmatprep.subr.mxu1 %v2355_v0 }
  0xbd   : > { %1856 = vmatmul.mubr.msk.f32.vlgmr.msra.gmra.mxu0 %vm902_vm2, %v667_v7 }
  0xbe   : > { %1862 = vmatprep.mubr.msk.f32.mxu0 %vm2356_vm0, %v2355_v0  ;;  %1859 = vmatpush3.msra.mxu0 %v1014_v58  ;;  %v1788_v58 = vld [vmem:[%s2809_s10 + $0x3] ss:$0 sm:$0xff] }
  0xbf   : > { %1860 = vmatprep.subr.mxu0 %v2355_v0 }
  0xc0   : > { %1861 = vmatpush3.msra.mxu0 %v1013_v60 }
  0xc1   : > { %1865 = vmatprep.subr.mxu0 %v2355_v0 }
 0x179   : > { %v747_v9 = vpop.f32.mrf.mxu0 }
 0x17a   : > { %v748_v10 = vadd.f32 %v1767_v8, %v747_v9 }
 0x17b   : > { %v1841_v11 = vpop.f32.mrf.mxu0 }
 0x17c   : > { %v753_v12 = vsel %vm677_vm1, %v748_v10, 0.0  ;;  %v1012_v11 = vld [vmem:[%s2804_s5 + $0x18] sm:$0xff] }
 0x17d   : > { %754 = vadd.xlane.f32.xlu0 %v753_v12  ;;  %v972_v14 = vpop.f32.mrf.mxu0  ;;  %v1011_v12 = vld [vmem:[%s2804_s5 + $0x10] sm:$0xff] }
 0x17e   : > { %v973_v15 = vadd.f32 %v1777_v13, %v972_v14  ;;  %v1010_v13 = vld [vmem:[%s2804_s5 + $0x8] sm:$0xff]  ;;  %v1009_v14 = vld [vmem:[%s2804_s5] sm:$0xff] }
 0x17f   : > { %v1857_v16 = vpop.f32.mrf.mxu0 }
 0x180   : > { %v979_v17 = vsel %vm978_vm3, %v973_v15, 0.0 }
 0x181   : > { %980 = vadd.xlane.f32.xlu1 %v979_v17 }
 0x206   : > { %v755_v18 = vpop.xlane.xlu0 %754 }
 0x207   : > { %v757_v19 = vmul.f32 0.03125, %v755_v18 }
 0x209   : > { %v758_v20 = vsub.f32 %v748_v10, %v757_v19  ;;  %v1774_v19 = vld [vmem:[%s2810_s11 + $0x1] ss:$0 sm:$0xff] }
 0x20a   : > { %v981_v27 = vpop.xlane.xlu1 %980 }
 0x20b   : > { %v759_v21 = vmul.f32 %v758_v20, %v758_v20  ;;  %v983_v28 = vmul.f32 0.0625, %v981_v27 }
 0x20d   : > { %v760_v22 = vsel %vm677_vm1, %v759_v21, 0.0  ;;  %v984_v29 = vsub.f32 %v973_v15, %v983_v28  ;;  %v1775_v21 = vld [vmem:[%s2811_s12 + $0x1] ss:$0 sm:$0xff] }
 0x20e   : > { %761 = vadd.xlane.f32.xlu0 %v760_v22 }
 0x20f   : > { %v985_v30 = vmul.f32 %v984_v29, %v984_v29 }
 0x211   : > { %v986_v31 = vsel %vm978_vm3, %v985_v30, 0.0  ;;  %v1784_v30 = vld [vmem:[%s2809_s10 + $0x2] ss:$0 sm:$0xff] }
 0x212   : > { %987 = vadd.xlane.f32.xlu0 %v986_v31 }
 0x297   : > { %v762_v32 = vpop.xlane.xlu0 %761 }
 0x298   : > { %v763_v33 = vmul.f32 0.03125, %v762_v32 }
 0x29a   : > { %v764_v34 = vadd.f32 1e-05, %v763_v33 }
 0x29b   : > { %v988_v46 = vpop.xlane.xlu0 %987 }
 0x29c   : > { %2024 = vrsqrt.f32 %v764_v34  ;;  %v989_v47 = vmul.f32 0.0625, %v988_v46 }
 0x29e   : > { %v990_v48 = vadd.f32 1e-05, %v989_v47 }
 0x2a9   : > { %v2025_v35 = vpop.eup %2024 }
 0x2aa   : > { %v766_v37 = vmul.f32 %v2025_v35, %v758_v20 }
 0x2ac   : > { %v771_v39 = vmul.f32 %v1769_v36, %v766_v37 }
 0x2ae   : > { %v776_v40 = vadd.f32 %v1770_v38, %v771_v39 }
 0x2b0   : > { %v778_v41 = vmin.f32 %v776_v40, 0.0  ;;  %vm777_vm4 = vcmp.gt.f32.partialorder %v776_v40, 0.0 }
 0x2b2   : > { %v779_v42 = vmul.f32 1.442695, %v778_v41  ;;  %v1200_v41 = vld [vmem:[#allocation10 + $0x10] sm:$0xff] }
 0x2b4   : > { %2026 = vpow2.f32 %v779_v42  ;;  %v1199_v42 = vld [vmem:[#allocation10 + $0x8] sm:$0xff] }
 0x2b5   : > { %2028 = vrsqrt.f32 %v990_v48  ;;  %v1785_v48 = vld [vmem:[%s2810_s11 + $0x2] ss:$0 sm:$0xff] }
 0x2c1   : > { %v2027_v43 = vpop.eup %2026 }
 0x2c2   : > { %v1771_v44 = vadd.f32 -1.0, %v2027_v43  ;;  %v2029_v49 = vpop.eup %2028  ;;  %v1198_v43 = vld [vmem:[#allocation10] sm:$0xff] }
 0x2c3   : > { %v992_v50 = vmul.f32 %v2029_v49, %v984_v29 }
 0x2c4   : > { %v782_v45 = vsel %vm777_vm4, %v776_v40, %v1771_v44  ;;  %v1201_v40 = vld [vmem:[#allocation10 + $0x18] sm:$0xff] }
 0x2c5   : > { %1851 = vmatmul.mubr.msk.f32.vlgmr.msra.gmra.mxu1 %vm677_vm1, %v782_v45  ;;  %v997_v52 = vmul.f32 %v1779_v51, %v992_v50  ;;  %v1786_v50 = vld [vmem:[%s2811_s12 + $0x2] ss:$0 sm:$0xff] }
 0x2c6   : > { %1884 = vmatprep.mubr.msk.f32.mxu1 %vm2356_vm0, %v2355_v0  ;;  %1877 = vmatpush3.msra.mxu1 %v1201_v40 }
 0x2c7   : > { %v1002_v54 = vadd.f32 %v1780_v53, %v997_v52  ;;  %1878 = vmatprep.subr.mxu1 %v2355_v0 }
 0x2c8   : > { %1879 = vmatpush3.msra.mxu1 %v1200_v41 }
 0x2c9   : > { %v1004_v55 = vmin.f32 %v1002_v54, 0.0  ;;  %vm1003_vm5 = vcmp.gt.f32.partialorder %v1002_v54, 0.0  ;;  %1880 = vmatprep.subr.mxu1 %v2355_v0 }
 0x2ca   : > { %1881 = vmatpush3.msra.mxu1 %v1199_v42  ;;  %v1457_v42 = vld [vmem:[#allocation13 + $0x78] sm:$0xff] }
 0x2cb   : > { %v1005_v56 = vmul.f32 1.442695, %v1004_v55  ;;  %1882 = vmatprep.subr.mxu1 %v2355_v0 }
 0x2cc   : > { %1883 = vmatpush3.msra.mxu1 %v1198_v43  ;;  %v1456_v43 = vld [vmem:[#allocation13 + $0x70] sm:$0xff] }
 0x2cd   : > { %2030 = vpow2.f32 %v1005_v56  ;;  %1477 = vmatprep.subr.mxu1 %v1457_v42 }
 0x2da   : > { %v2031_v57 = vpop.eup %2030 }
 0x2db   : > { %v1781_v59 = vadd.f32 -1.0, %v2031_v57 }
 0x2dd   : > { %v1008_v61 = vsel %vm1003_vm5, %v1002_v54, %v1781_v59 }
 0x2de   : > { %1863 = vmatmul.mubr.msk.f32.vlgmr.msra.gmra.mxu0 %vm978_vm3, %v1008_v61 }
 0x2df   : > { %1873 = vmatprep.mubr.msk.f32.mxu0 %vm2356_vm0, %v2355_v0  ;;  %1866 = vmatpush3.msra.mxu0 %v1012_v11 }
 0x2e0   : > { %1867 = vmatprep.subr.mxu0 %v2355_v0 }
 0x2e1   : > { %1868 = vmatpush3.msra.mxu0 %v1011_v12 }
 0x2e2   : > { %1869 = vmatprep.subr.mxu0 %v2355_v0 }
 0x2e3   : > { %1870 = vmatpush3.msra.mxu0 %v1010_v13  ;;  %v1790_v13 = vld [vmem:[%s2810_s11 + $0x3] ss:$0 sm:$0xff] }
 0x2e4   : > { %1871 = vmatprep.subr.mxu0 %v2355_v0 }
 0x2e5   : > { %1872 = vmatpush3.msra.mxu0 %v1009_v14 }
 0x2e6   : > { %1887 = vmatprep.subr.mxu0 %v2355_v0 }
 0x385   : > { %v861_v63 = vpop.f32.mrf.mxu1 }
 0x386   : > { %v862_v1 = vadd.f32 %v1772_v62, %v861_v63 }
 0x387   : > { %v1852_v2 = vpop.f32.mrf.mxu1 }
 0x388   : > { %v867_v3 = vsel %vm677_vm1, %v862_v1, 0.0 }
 0x389   : > { %868 = vadd.xlane.f32.xlu1 %v867_v3 }
 0x39e   : > { %v1084_v4 = vpop.f32.mrf.mxu0 }
 0x3a0   : > { %v1864_v5 = vpop.f32.mrf.mxu0 }
 0x3a1   : > { %v1314_v5 = vld [vmem:[#allocation12 + $0x18] sm:$0xff] }
 0x412   : > { %v869_v6 = vpop.xlane.xlu1 %868 }
 0x413   : > { %v870_v7 = vmul.f32 0.03125, %v869_v6  ;;  %v1313_v6 = vld [vmem:[#allocation12 + $0x10] sm:$0xff] }
 0x415   : > { %v871_v8 = vsub.f32 %v862_v1, %v870_v7  ;;  %v1312_v7 = vld [vmem:[#allocation12 + $0x8] sm:$0xff] }
 0x417   : > { %v872_v9 = vmul.f32 %v871_v8, %v871_v8 }
 0x419   : > { %v873_v10 = vsel %vm677_vm1, %v872_v9, 0.0 }
 0x41a   : > { %874 = vadd.xlane.f32.xlu1 %v873_v10 }
 0x4a3   : > { %v875_v15 = vpop.xlane.xlu1 %874 }
 0x4a4   : > { %v876_v16 = vmul.f32 0.03125, %v875_v15  ;;  %v1791_v15 = vld [vmem:[%s2811_s12 + $0x3] ss:$0 sm:$0xff] }
 0x4a6   : > { %v877_v17 = vadd.f32 1e-05, %v876_v16 }
 0x4a8   : > { %2032 = vrsqrt.f32 %v877_v17 }
 0x4b5   : > { %v2033_v18 = vpop.eup %2032 }
 0x4b6   : > { %v879_v20 = vmul.f32 %v2033_v18, %v871_v8  ;;  %v1311_v8 = vld [vmem:[#allocation12] sm:$0xff] }
 0x4b8   : > { %v884_v22 = vmul.f32 %v1774_v19, %v879_v20 }
 0x4ba   : > { %v889_v23 = vadd.f32 %v1775_v21, %v884_v22  ;;  %v1393_v22 = vlaneseq }
 0x4bc   : > { %v891_v24 = vmin.f32 %v889_v23, 0.0  ;;  %vm890_vm6 = vcmp.gt.f32.partialorder %v889_v23, 0.0 }
 0x4be   : > { %v892_v25 = vmul.f32 1.442695, %v891_v24  ;;  %v1793_v24 = vld [vmem:[%s2855_s25] ss:$0 sm:$0xff] }
 0x4c0   : > { %2034 = vpow2.f32 %v892_v25 }
 0x4cd   : > { %v2035_v26 = vpop.eup %2034 }
 0x4ce   : > { %v1776_v27 = vadd.f32 -1.0, %v2035_v26 }
 0x4d0   : > { %v895_v28 = vsel %vm890_vm6, %v889_v23, %v1776_v27  ;;  %v2746_v23 = vand.u32 127, %v1393_v22 }
 0x4d1   : > { %1874 = vmatmul.mubr.msk.f32.vlgmr.msra.gmra.mxu0 %vm677_vm1, %v895_v28 }
 0x4d2   : > { %1895 = vmatprep.mubr.msk.f32.mxu0 %vm2356_vm0, %v2355_v0  ;;  %1888 = vmatpush3.msra.mxu0 %v1314_v5  ;;  %vm1397_vm9 = vcmp.lt.s32.totalorder %v2746_v23, 32  ;;  %vm1583_vm14 = vcmp.eq.s32.totalorder %v2746_v23, 0 }
 0x4d3   : > { %1889 = vmatprep.subr.mxu0 %v2355_v0 }
 0x4d4   : > { %1890 = vmatpush3.msra.mxu0 %v1313_v6 }
 0x4d5   : > { %1891 = vmatprep.subr.mxu0 %v2355_v0 }
 0x4d6   : > { %1892 = vmatpush3.msra.mxu0 %v1312_v7 }
 0x4d7   : > { %1893 = vmatprep.subr.mxu0 %v2355_v0 }
 0x4d8   : > { %1894 = vmatpush3.msra.mxu0 %v1311_v8 }
 0x591   : > { %v1157_v29 = vpop.f32.mrf.mxu0 }
 0x592   : > { %v1158_v31 = vadd.f32 %v1157_v29, %v1084_v4 }
 0x593   : > { %v1875_v32 = vpop.f32.mrf.mxu0 }
 0x594   : > { %v1166_v33 = vadd.f32 %v1784_v30, %v1158_v31 }
 0x596   : > { %v1169_v34 = vsel %vm677_vm1, %v1166_v33, 0.0 }
 0x597   : > { %1170 = vadd.xlane.f32.xlu0 %v1169_v34 }
 0x620   : > { %v1171_v35 = vpop.xlane.xlu0 %1170 }
 0x621   : > { %v1172_v36 = vmul.f32 0.03125, %v1171_v35 }
 0x623   : > { %v1173_v37 = vsub.f32 %v1166_v33, %v1172_v36 }
 0x625   : > { %v1174_v38 = vmul.f32 %v1173_v37, %v1173_v37 }
 0x627   : > { %v1175_v39 = vsel %vm677_vm1, %v1174_v38, 0.0 }
 0x628   : > { %1176 = vadd.xlane.f32.xlu1 %v1175_v39 }
 0x6b1   : > { %v1177_v44 = vpop.xlane.xlu1 %1176 }
 0x6b2   : > { %v1178_v45 = vmul.f32 0.03125, %v1177_v44  ;;  %v1455_v44 = vld [vmem:[#allocation13 + $0x68] sm:$0xff] }
 0x6b4   : > { %v1179_v46 = vadd.f32 1e-05, %v1178_v45  ;;  %v1454_v45 = vld [vmem:[#allocation13 + $0x60] sm:$0xff] }
 0x6b6   : > { %2036 = vrsqrt.f32 %v1179_v46  ;;  %v1453_v46 = vld [vmem:[#allocation13 + $0x58] sm:$0xff] }
 0x6c3   : > { %v2037_v47 = vpop.eup %2036 }
 0x6c4   : > { %v1181_v49 = vmul.f32 %v2037_v47, %v1173_v37  ;;  %v1452_v47 = vld [vmem:[#allocation13 + $0x50] sm:$0xff] }
 0x6c6   : > { %v1186_v51 = vmul.f32 %v1785_v48, %v1181_v49  ;;  %v1451_v48 = vld [vmem:[#allocation13 + $0x48] sm:$0xff]  ;;  %v1450_v49 = vld [vmem:[#allocation13 + $0x40] sm:$0xff] }
 0x6c8   : > { %v1191_v52 = vadd.f32 %v1786_v50, %v1186_v51  ;;  %v1449_v50 = vld [vmem:[#allocation13 + $0x38] sm:$0xff]  ;;  %v1448_v51 = vld [vmem:[#allocation13 + $0x30] sm:$0xff] }
 0x6ca   : > { %v1193_v53 = vmin.f32 %v1191_v52, 0.0  ;;  %vm1192_vm7 = vcmp.gt.f32.partialorder %v1191_v52, 0.0 }
 0x6cc   : > { %v1194_v54 = vmul.f32 1.442695, %v1193_v53  ;;  %v1446_v53 = vld [vmem:[#allocation13 + $0x20] sm:$0xff] }
 0x6ce   : > { %2038 = vpow2.f32 %v1194_v54  ;;  %v1445_v54 = vld [vmem:[#allocation13 + $0x18] sm:$0xff] }
 0x6db   : > { %v2039_v55 = vpop.eup %2038 }
 0x6dc   : > { %v1787_v56 = vadd.f32 -1.0, %v2039_v55  ;;  %v1444_v55 = vld [vmem:[#allocation13 + $0x10] sm:$0xff] }
 0x6de   : > { %v1197_v57 = vsel %vm1192_vm7, %v1191_v52, %v1787_v56  ;;  %v1447_v52 = vld [vmem:[#allocation13 + $0x28] sm:$0xff] }
 0x6df   : > { %1885 = vmatmul.mubr.msk.f32.vlgmr.msra.gmra.mxu1 %vm677_vm1, %v1197_v57  ;;  %v1443_v56 = vld [vmem:[#allocation13 + $0x8] sm:$0xff]  ;;  %v1442_v57 = vld [vmem:[#allocation13] sm:$0xff] }
 0x6e0   : > { %1525 = vmatprep.mubr.f32.mxu1 %v2355_v0  ;;  %1478 = vmatpush1.msra.mxu1 %v1456_v43 }
 0x6e1   : > { %1479 = vmatprep.subr.mxu1 %v1455_v44 }
 0x6e2   : > { %1480 = vmatpush1.msra.mxu1 %v1454_v45 }
 0x6e3   : > { %1481 = vmatprep.subr.mxu1 %v1453_v46 }
 0x6e4   : > { %1482 = vmatpush1.msra.mxu1 %v1452_v47 }
 0x6e5   : > { %1483 = vmatprep.subr.mxu1 %v1451_v48 }
 0x6e6   : > { %1484 = vmatpush1.msra.mxu1 %v1450_v49 }
 0x6e7   : > { %1485 = vmatprep.subr.mxu1 %v1449_v50 }
 0x6e8   : > { %1486 = vmatpush1.msra.mxu1 %v1448_v51 }
 0x6e9   : > { %1487 = vmatprep.subr.mxu1 %v1447_v52 }
 0x6ea   : > { %1488 = vmatpush1.msra.mxu1 %v1446_v53 }
 0x6eb   : > { %1489 = vmatprep.subr.mxu1 %v1445_v54 }
 0x6ec   : > { %1490 = vmatpush1.msra.mxu1 %v1444_v55 }
 0x6ed   : > { %1491 = vmatprep.subr.mxu1 %v1443_v56 }
 0x6ee   : > { %1492 = vmatpush1.msra.mxu1 %v1442_v57 }
 0x79f   : > { %v1276_v59 = vpop.f32.mrf.mxu1 }
 0x7a0   : > { %v1277_v60 = vadd.f32 %v1788_v58, %v1276_v59 }
 0x7a1   : > { %v1886_v61 = vpop.f32.mrf.mxu1 }
 0x7a2   : > { %v1282_v62 = vsel %vm677_vm1, %v1277_v60, 0.0 }
 0x7a3   : > { %1283 = vadd.xlane.f32.xlu0 %v1282_v62 }
 0x82c   : > { %v1284_v63 = vpop.xlane.xlu0 %1283 }
 0x82d   : > { %v1285_v1 = vmul.f32 0.03125, %v1284_v63 }
 0x82f   : > { %v1286_v2 = vsub.f32 %v1277_v60, %v1285_v1  ;;  %v1795_v1 = vld [vmem:[%s2855_s25 + $0x1] ss:$0 sm:$0xff] }
 0x831   : > { %v1287_v3 = vmul.f32 %v1286_v2, %v1286_v2 }
 0x833   : > { %v1288_v4 = vsel %vm677_vm1, %v1287_v3, 0.0  ;;  %v1796_v3 = vld [vmem:[%s2855_s25 + $0x2] ss:$0 sm:$0xff] }
 0x834   : > { %1289 = vadd.xlane.f32.xlu1 %v1288_v4 }
 0x8bd   : > { %v1290_v9 = vpop.xlane.xlu1 %1289 }
 0x8be   : > { %v1291_v10 = vmul.f32 0.03125, %v1290_v9 }
 0x8c0   : > { %v1292_v11 = vadd.f32 1e-05, %v1291_v10 }
 0x8c2   : > { %2040 = vrsqrt.f32 %v1292_v11  ;;  %v1532_v11 = vadd.s32 128, %v2746_v23 }
 0x8c4   : > { %vm1534_vm12 = vcmp.lt.s32.totalorder %v1532_v11, 255  ;;  %vm1573_vm13 = vcmp.eq.s32.totalorder %v1532_v11, 255 }
 0x8cf   : > { %v2041_v12 = vpop.eup %2040 }
 0x8d0   : > { %v1294_v14 = vmul.f32 %v2041_v12, %v1286_v2 }
 0x8d2   : > { %v1299_v16 = vmul.f32 %v1790_v13, %v1294_v14 }
 0x8d4   : > { %v1304_v17 = vadd.f32 %v1791_v15, %v1299_v16 }
 0x8d6   : > { %v1306_v18 = vmin.f32 %v1304_v17, 0.0  ;;  %vm1305_vm8 = vcmp.gt.f32.partialorder %v1304_v17, 0.0 }
 0x8d8   : > { %v1307_v19 = vmul.f32 1.442695, %v1306_v18 }
 0x8da   : > { %2042 = vpow2.f32 %v1307_v19 }
 0x8e7   : > { %v2043_v0 = vpop.eup %2042 }
 0x8e8   : > { %v1792_v20 = vadd.f32 -1.0, %v2043_v0 }
 0x8ea   : > { %v1310_v21 = vsel %vm1305_vm8, %v1304_v17, %v1792_v20 }
 0x8eb   : > { %1896 = vmatmul.mubr.msk.f32.vlgmr.msra.gmra.mxu0 %vm677_vm1, %v1310_v21  ;;  %v1556_v21 = vshrl.u32 %v1393_v22, 7 }
 0x9ab   : > { %v1389_v25 = vpop.f32.mrf.mxu0 }
 0x9ac   : > { %v1390_v26 = vadd.f32 %v1793_v24, %v1389_v25  ;;  %v1557_v24 = vsub.s32 0, %v1556_v21  ;;  %v1553_v25 = vld [vmem:[%s2856_s29] sm:$0x3] }
 0x9ad   : > { %v1897_v27 = vpop.f32.mrf.mxu0 }
 0x9ae   : > { %v1405_v28 = vsel %vm1397_vm9, 0.0, %v1390_v26  ;;  %v1400_v29 = vsel %vm1397_vm9, %v1390_v26, 0.0  ;;  %v1558_v27 = vrot.slane %v1553_v25, %v1557_v24 }
 0x9af   : > { %v1406_v30 = vsel %vm1401_vm10, %v1405_v28, 0.0  ;;  %v1402_v31 = vsel %vm1401_vm10, %v1400_v29, 0.0 }
 0x9b0   : > { %1407 = vadd.xlane.f32.xlu1 %v1406_v30  ;;  %1403 = vadd.xlane.f32.xlu0 %v1402_v31 }
 0xa39   : > { %v1408_v32 = vpop.xlane.xlu1 %1407  ;;  %v1404_v33 = vpop.xlane.xlu0 %1403 }
 0xa3a   : > { %v1409_v34 = vsel %vm1397_vm9, %v1404_v33, %v1408_v32 }
 0xa3b   : > { %v1410_v35 = vmul.f32 0.03125, %v1409_v34 }
 0xa3d   : > { %v1411_v36 = vsub.f32 %v1390_v26, %v1410_v35  ;;  %v1561_v26 = vsub.s32 1, %v1556_v21 }
 0xa3f   : > { %v1412_v37 = vmul.f32 %v1411_v36, %v1411_v36  ;;  %v1562_v28 = vrot.slane %v1553_v25, %v1561_v26 }
 0xa41   : > { %v1417_v38 = vsel %vm1397_vm9, 0.0, %v1412_v37  ;;  %v1413_v39 = vsel %vm1397_vm9, %v1412_v37, 0.0 }
 0xa42   : > { %v1418_v40 = vsel %vm1401_vm10, %v1417_v38, 0.0  ;;  %v1414_v41 = vsel %vm1401_vm10, %v1413_v39, 0.0 }
 0xa43   : > { %1419 = vadd.xlane.f32.xlu1 %v1418_v40  ;;  %1415 = vadd.xlane.f32.xlu0 %v1414_v41 }
 0xacc   : > { %v1420_v58 = vpop.xlane.xlu1 %1419  ;;  %v1416_v59 = vpop.xlane.xlu0 %1415 }
 0xacd   : > { %v1421_v60 = vsel %vm1397_vm9, %v1416_v59, %v1420_v58 }
 0xace   : > { %v1422_v61 = vmul.f32 0.03125, %v1421_v60 }
 0xad0   : > { %v1423_v62 = vadd.f32 1e-05, %v1422_v61 }
 0xad2   : > { %2044 = vrsqrt.f32 %v1423_v62 }
 0xadf   : > { %v2045_v63 = vpop.eup %2044 }
 0xae0   : > { %v1425_v2 = vmul.f32 %v2045_v63, %v1411_v36 }
 0xae2   : > { %v1430_v4 = vmul.f32 %v1795_v1, %v1425_v2 }
 0xae4   : > { %v1435_v5 = vadd.f32 %v1796_v3, %v1430_v4 }
 0xae6   : > { %v1437_v6 = vmin.f32 %v1435_v5, 0.0  ;;  %vm1436_vm11 = vcmp.gt.f32.partialorder %v1435_v5, 0.0 }
 0xae8   : > { %v1438_v7 = vmul.f32 1.442695, %v1437_v6 }
 0xaea   : > { %2046 = vpow2.f32 %v1438_v7 }
 0xaf7   : > { %v2047_v8 = vpop.eup %2046 }
 0xaf8   : > { %v1797_v9 = vadd.f32 -1.0, %v2047_v8 }
 0xafa   : > { %v1441_v10 = vsel %vm1436_vm11, %v1435_v5, %v1797_v9 }
 0xafb   : > { %1798 = vmatmul.mubr.msk.f32.vlgmr.msra.gmra.mxu1 %vm1401_vm10, %v1441_v10 }
 0xbbb   : > { %v1527_v12 = vpop.f32.mrf.mxu1 }
 0xbbd   : > { %v1529_v13 = vpop.f32.mrf.mxu1 }
 0xbbe   : > { %v1540_v14 = vsel %vm1534_vm12, %v1529_v13, -inf  ;;  %v1579_v15 = vsel %vm1573_vm13, %v1529_v13, 0.0 }
 0xbbf   : > { %v1541_v16 = vmax.f32 %v1527_v12, %v1540_v14 }
 0xbc1   : > { %1542 = vmax.xlane.f32.xlu0 %v1541_v16 }
 0xc4a   : > { %v1543_v17 = vpop.xlane.xlu0 %1542 }
 0xc4b   : > { %v1544_v18 = vsub.f32 %v1527_v12, %v1543_v17  ;;  %v1545_v19 = vsub.f32 %v1540_v14, %v1543_v17 }
 0xc4d   : > { %v1546_v0 = vmul.f32 1.442695, %v1544_v18  ;;  %v1548_v20 = vmul.f32 1.442695, %v1545_v19 }
 0xc4f   : > { %2048 = vpow2.f32 %v1546_v0 }
 0xc50   : > { %2050 = vpow2.f32 %v1548_v20 }
 0xc5c   : > { %v2049_v29 = vpop.eup %2048 }
 0xc5d   : > { %v2051_v30 = vpop.eup %2050  ;;  %v1565_v31 = vmul.f32 %v2049_v29, %v1558_v27 }
 0xc5e   : > { %v1550_v32 = vadd.f32 %v2051_v30, %v2049_v29  ;;  %v1566_v33 = vmul.f32 %v2051_v30, %v1562_v28 }
 0xc60   : > { %1551 = vadd.xlane.f32.xlu1 %v1550_v32  ;;  %v1567_v34 = vadd.f32 %v1566_v33, %v1565_v31 }
 0xc62   : > { %1568 = vadd.xlane.f32.xlu0 %v1567_v34 }
 0xc64   : > { %1581 = vadd.xlane.f32.xlu1 %v1579_v15 }
 0xce9   : > { %v1552_v35 = vpop.xlane.xlu1 %1551 }
 0xcea   : > { %2052 = vrcp.f32 %v1552_v35 }
 0xceb   : > { %v1569_v36 = vpop.xlane.xlu0 %1568 }
 0xced   : > { %v1582_v38 = vpop.xlane.xlu1 %1581 }
 0xcf7   : > { %v2053_v22 = vpop.eup %2052 }
 0xcf8   : > { %v1571_v37 = vmul.f32 %v2053_v22, %v1569_v36 }
 0xcfa   : > { %v1586_v39 = vsel %vm1583_vm14, %v1571_v37, %v1582_v38 }
 0xcfb   : > { %1588 = vst.msk [vmem:[%s665_s14] sm:$0xff] %vm1587_vm15, %v1586_v39 }
 0xcfc PF: > { %p30_p8 = scmp.ge.s32.totalorder %s2565_s19, 4   ;;  %s2858_s21 = smov %s2332_s22 }
 0xcfd   : > { %s2859_s22 = smov %s2336_s23  ;;  %s2860_s23 = smov %s2577_s30 }
 0xcfe   : > { %s2861_s24 = smov %s2565_s19  ;;  %32 = sbr.rel (!%p30_p8) target bundleno = 16 (0x10), region = 159 }
 0xd03   :  { %1608 = vsyncpa [#allocation3], 1 }
 0xd04   :  { %1610 = vsyncpa [#allocation3 + $0x1], 1 }
 0xd05   :  { %1611 = vsyncpa [#allocation5], 1 }
 0xd06   :  { %1612 = vsyncpa [#allocation8], 1 }
 0xd07   :  { %1613 = vsyncpa [#allocation11], 1 }
 0xd08   :  { %1614 = vsyncpa [#allocation14], 1 }

</bundles_post_ra>
